<compile_context>
chip_gen: v5e
topology: v5e:2x2
jax: 0.10.0
libtpu: 0.0.40
codegen_flags: <defaults>
</compile_context>

<pallas_src>
import math

import jax
import jax.numpy as jnp
from jax.experimental import pallas as pl
from jax.experimental.pallas import tpu as pltpu

IN_DIM = 1 * 28 * 28   # 784
H1 = 512
H2 = 256
OUT_DIM = 10
OUT_PAD = 128          # lane-dense fc3 output width (sliced back to 10 in wrapper)


def _round_up(x, m):
    return ((x + m - 1) // m) * m


def _choose_tb(B):
    """Batch tile: big enough to amortize the ~0.35us grid-step overhead,
    M aligned to the MXU, and >=2 grid blocks when possible so both v7x
    TensorCores get work under dimension_semantics=("parallel",)."""
    if B <= 128:
        return _round_up(B, 8)
    # >= 2 blocks, M a multiple of 128 (full MXU passes), capped at 2048 rows
    # (~30 MiB VMEM including double buffers and f32 intermediates).
    return min(2048, _round_up((B + 1) // 2, 128))


def _mlp_kernel(x_ref, w1_ref, b1_ref, w2_ref, b2_ref, w3_ref, b3_ref, o_ref):
    # fc1 + ReLU  (dropout1 is identity in eval mode).
    # x arrives as f32 straight from HBM; cast to bf16 at the MXU input so the
    # wrapper never burns a separate HBM pass on the cast.
    x = x_ref[...].astype(jnp.bfloat16)
    h1 = jnp.dot(x, w1_ref[...], preferred_element_type=jnp.float32)
    h1 = jnp.maximum(h1 + b1_ref[...], 0.0)

    # fc2 + ReLU  (dropout2 is identity in eval mode)
    h2 = jnp.dot(h1.astype(jnp.bfloat16), w2_ref[...],
                 preferred_element_type=jnp.float32)
    h2 = jnp.maximum(h2 + b2_ref[...], 0.0)

    # fc3 (logits; output lane-padded to 128, padding cols of W3/b3 are zero).
    out = jnp.dot(h2.astype(jnp.bfloat16), w3_ref[...],
                  preferred_element_type=jnp.float32)
    # bf16 writeback (f32 accumulation above) halves the lane-padded store.
    o_ref[...] = (out + b3_ref[...]).astype(o_ref.dtype)


def net3_forward(img, params):
    """img: (B, 1, 28, 28) float32 (NCHW, like PyTorch). Returns (B, 10) f32."""
    w1, b1, w2, b2, w3, b3 = params
    B = img.shape[0]
    x = img.reshape(B, -1)          # free reshape; NO dtype cast here

    # fc3 is normally pre-padded to 128 lanes by init_params (one-time prep);
    # pad here only if the caller handed us the raw (256, 10) weights.
    if w3.shape[-1] != OUT_PAD:
        w3 = jnp.pad(w3, ((0, 0), (0, OUT_PAD - w3.shape[-1])))
        b3 = jnp.pad(b3, ((0, 0), (0, OUT_PAD - b3.shape[-1])))

    TB = _choose_tb(B)
    n_blocks = pl.cdiv(B, TB)       # Pallas masks the ragged last block itself
    resident = lambda shape: pl.BlockSpec(shape, lambda i: (0, 0))

    weight_bytes = (w1.size + w2.size + w3.size) * 2 \
        + (b1.size + b2.size + b3.size) * 4
    cost = pl.CostEstimate(
        flops=2 * B * (IN_DIM * H1 + H1 * H2 + H2 * OUT_PAD),
        transcendentals=0,
        bytes_accessed=x.size * 4 + weight_bytes + B * OUT_PAD * 2,
    )

    out = pl.pallas_call(
        _mlp_kernel,
        out_shape=jax.ShapeDtypeStruct((B, OUT_PAD), jnp.bfloat16),
        grid=(n_blocks,),
        in_specs=[
            pl.BlockSpec((TB, IN_DIM), lambda i: (i, 0)),     # x: streamed per tile
            resident((IN_DIM, H1)), resident((1, H1)),        # fc1 (VMEM-resident)
            resident((H1, H2)), resident((1, H2)),            # fc2
            resident((H2, OUT_PAD)), resident((1, OUT_PAD)),  # fc3 (lane-padded)
        ],
        out_specs=pl.BlockSpec((TB, OUT_PAD), lambda i: (i, 0)),
        compiler_params=pltpu.CompilerParams(
            dimension_semantics=("parallel",),
            vmem_limit_bytes=48 << 20,
        ),
        cost_estimate=cost,
    )(x, w1, b1, w2, b2, w3, b3)

    # Upcast + slice the lane-padded bf16 logits back to (B, 10) f32.
    return out[:, :OUT_DIM].astype(jnp.float32)


def init_params(key):
    """Init matching nn.Linear's U(-1/sqrt(fan_in), 1/sqrt(fan_in)).

    Weights stored as (in, out) (transposed vs PyTorch) in bf16; biases as
    (1, out) f32.  fc3 is pre-padded once here to 128 output lanes (zero
    columns) so net3_forward does no per-call padding work.
    """
    ks = jax.random.split(key, 6)

    def linear(kw, kb, fan_in, fan_out, pad_to=None):
        bound = 1.0 / math.sqrt(fan_in)
        w = jax.random.uniform(kw, (fan_in, fan_out), jnp.float32, -bound, bound)
        b = jax.random.uniform(kb, (1, fan_out), jnp.float32, -bound, bound)
        if pad_to is not None and pad_to > fan_out:
            w = jnp.pad(w, ((0, 0), (0, pad_to - fan_out)))
            b = jnp.pad(b, ((0, 0), (0, pad_to - fan_out)))
        return w.astype(jnp.bfloat16), b

    w1, b1 = linear(ks[0], ks[1], IN_DIM, H1)
    w2, b2 = linear(ks[2], ks[3], H1, H2)
    w3, b3 = linear(ks[4], ks[5], H2, OUT_DIM, pad_to=OUT_PAD)
    return (w1, b1, w2, b2, w3, b3)


if __name__ == "__main__":
    key = jax.random.PRNGKey(0)
    k_params, k_img = jax.random.split(key)

    params = init_params(k_params)
    img = jax.random.normal(k_img, (8, 1, 28, 28), jnp.float32)  # NCHW like PyTorch

    out = jax.block_until_ready(net3_forward(img, params))
    assert out.shape == (8, OUT_DIM)

    # Plain-JAX reference (eval-mode dropout = identity), mirroring the
    # kernel's bf16 inputs/weights, f32 accumulation and bf16 logit store.
    w1, b1, w2, b2, w3, b3 = params
    f32 = lambda a: a.astype(jnp.float32)
    hp = jax.lax.Precision.HIGHEST
    x = f32(img.reshape(img.shape[0], -1).astype(jnp.bfloat16))
    h1 = jnp.maximum(jnp.dot(x, f32(w1), precision=hp) + b1, 0.0)
    h1 = f32(h1.astype(jnp.bfloat16))
    h2 = jnp.maximum(jnp.dot(h1, f32(w2), precision=hp) + b2, 0.0)
    h2 = f32(h2.astype(jnp.bfloat16))
    ref = jnp.dot(h2, f32(w3), precision=hp) + b3
    ref = f32(ref[:, :OUT_DIM].astype(jnp.bfloat16))

    assert jnp.allclose(out, ref, atol=5e-2, rtol=5e-2), float(
        jnp.max(jnp.abs(out - ref)))
    print("KERNEL_OK")
</pallas_src>

<mosaic_0001>
module attributes {stable_mosaic.version = 11 : i64} {
  func.func @_mlp_kernel(%arg0: i32, %arg1: memref<8x784xf32, #tpu.memory_space<vmem>>, %arg2: memref<784x512xbf16, #tpu.memory_space<vmem>>, %arg3: memref<1x512xf32, #tpu.memory_space<vmem>>, %arg4: memref<512x256xbf16, #tpu.memory_space<vmem>>, %arg5: memref<1x256xf32, #tpu.memory_space<vmem>>, %arg6: memref<256x128xbf16, #tpu.memory_space<vmem>>, %arg7: memref<1x128xf32, #tpu.memory_space<vmem>>, %arg8: memref<8x128xbf16, #tpu.memory_space<vmem>>) attributes {dimension_semantics = [#tpu.dimension_semantics<parallel>], iteration_bounds = array<i64: 1>, scalar_prefetch = 0 : i64, scratch_operands = 0 : i64, tpu.core_type = #tpu.core_type<tc>, window_params = [{transform_indices = @transform_0, window_bounds = array<i64: 8, 784>}, {pipeline_mode = #tpu.pipeline_mode<synchronous>, transform_indices = @transform_1, window_bounds = array<i64: 784, 512>}, {pipeline_mode = #tpu.pipeline_mode<synchronous>, transform_indices = @transform_2, window_bounds = array<i64: 1, 512>}, {pipeline_mode = #tpu.pipeline_mode<synchronous>, transform_indices = @transform_3, window_bounds = array<i64: 512, 256>}, {pipeline_mode = #tpu.pipeline_mode<synchronous>, transform_indices = @transform_4, window_bounds = array<i64: 1, 256>}, {pipeline_mode = #tpu.pipeline_mode<synchronous>, transform_indices = @transform_5, window_bounds = array<i64: 256, 128>}, {pipeline_mode = #tpu.pipeline_mode<synchronous>, transform_indices = @transform_6, window_bounds = array<i64: 1, 128>}, {transform_indices = @transform_7, window_bounds = array<i64: 8, 128>}]} {
    %c0 = arith.constant 0 : index
    %c0_0 = arith.constant 0 : index
    %0 = vector.load %arg1[%c0, %c0_0] : memref<8x784xf32, #tpu.memory_space<vmem>>, vector<8x784xf32>
    %1 = arith.truncf %0 : vector<8x784xf32> to vector<8x784xbf16>
    %c0_1 = arith.constant 0 : index
    %c0_2 = arith.constant 0 : index
    %2 = vector.load %arg2[%c0_1, %c0_2] : memref<784x512xbf16, #tpu.memory_space<vmem>>, vector<784x512xbf16>
    %cst = arith.constant dense<0.000000e+00> : vector<8x512xf32>
    %3 = tpu.matmul %1, %2, %cst {dimension_numbers = #tpu.dot_dimension_numbers<[1], [0], [0], [1], [0, 0, 1, 1], [], []>} : vector<8x784xbf16>, vector<784x512xbf16>, vector<8x512xf32> -> vector<8x512xf32>
    %c0_3 = arith.constant 0 : index
    %c0_4 = arith.constant 0 : index
    %4 = vector.load %arg3[%c0_3, %c0_4] : memref<1x512xf32, #tpu.memory_space<vmem>>, vector<1x512xf32>
    %5 = vector.broadcast %4 : vector<1x512xf32> to vector<8x512xf32>
    %6 = arith.addf %3, %5 : vector<8x512xf32>
    %cst_5 = arith.constant 0.000000e+00 : f32
    %7 = vector.broadcast %cst_5 : f32 to vector<8x512xf32>
    %8 = arith.maximumf %6, %7 : vector<8x512xf32>
    %9 = arith.truncf %8 : vector<8x512xf32> to vector<8x512xbf16>
    %c0_6 = arith.constant 0 : index
    %c0_7 = arith.constant 0 : index
    %10 = vector.load %arg4[%c0_6, %c0_7] : memref<512x256xbf16, #tpu.memory_space<vmem>>, vector<512x256xbf16>
    %cst_8 = arith.constant dense<0.000000e+00> : vector<8x256xf32>
    %11 = tpu.matmul %9, %10, %cst_8 {dimension_numbers = #tpu.dot_dimension_numbers<[1], [0], [0], [1], [0, 0, 1, 1], [], []>} : vector<8x512xbf16>, vector<512x256xbf16>, vector<8x256xf32> -> vector<8x256xf32>
    %c0_9 = arith.constant 0 : index
    %c0_10 = arith.constant 0 : index
    %12 = vector.load %arg5[%c0_9, %c0_10] : memref<1x256xf32, #tpu.memory_space<vmem>>, vector<1x256xf32>
    %13 = vector.broadcast %12 : vector<1x256xf32> to vector<8x256xf32>
    %14 = arith.addf %11, %13 : vector<8x256xf32>
    %cst_11 = arith.constant 0.000000e+00 : f32
    %15 = vector.broadcast %cst_11 : f32 to vector<8x256xf32>
    %16 = arith.maximumf %14, %15 : vector<8x256xf32>
    %17 = arith.truncf %16 : vector<8x256xf32> to vector<8x256xbf16>
    %c0_12 = arith.constant 0 : index
    %c0_13 = arith.constant 0 : index
    %18 = vector.load %arg6[%c0_12, %c0_13] : memref<256x128xbf16, #tpu.memory_space<vmem>>, vector<256x128xbf16>
    %cst_14 = arith.constant dense<0.000000e+00> : vector<8x128xf32>
    %19 = tpu.matmul %17, %18, %cst_14 {dimension_numbers = #tpu.dot_dimension_numbers<[1], [0], [0], [1], [0, 0, 1, 1], [], []>} : vector<8x256xbf16>, vector<256x128xbf16>, vector<8x128xf32> -> vector<8x128xf32>
    %c0_15 = arith.constant 0 : index
    %c0_16 = arith.constant 0 : index
    %20 = vector.load %arg7[%c0_15, %c0_16] : memref<1x128xf32, #tpu.memory_space<vmem>>, vector<1x128xf32>
    %21 = vector.broadcast %20 : vector<1x128xf32> to vector<8x128xf32>
    %22 = arith.addf %19, %21 : vector<8x128xf32>
    %23 = arith.truncf %22 : vector<8x128xf32> to vector<8x128xbf16>
    %c0_17 = arith.constant 0 : index
    %c0_18 = arith.constant 0 : index
    %24 = vector.load %arg8[%c0_17, %c0_18] : memref<8x128xbf16, #tpu.memory_space<vmem>>, vector<8x128xbf16>
    tpu.vector_store %arg8[%c0_17, %c0_18], %23 {strides = array<i32>} : memref<8x128xbf16, #tpu.memory_space<vmem>>, vector<8x128xbf16>,
    return
  }
  func.func @transform_0(%arg0: i32) -> (i32, i32) {
    %c0_i32 = arith.constant 0 : i32
    %c0_i32_0 = arith.constant 0 : i32
    return %arg0, %c0_i32 : i32, i32
  }
  func.func @transform_1(%arg0: i32) -> (i32, i32) {
    %c0_i32 = arith.constant 0 : i32
    %c0_i32_0 = arith.constant 0 : i32
    %c0_i32_1 = arith.constant 0 : i32
    return %c0_i32, %c0_i32_0 : i32, i32
  }
  func.func @transform_2(%arg0: i32) -> (i32, i32) {
    %c0_i32 = arith.constant 0 : i32
    %c0_i32_0 = arith.constant 0 : i32
    %c0_i32_1 = arith.constant 0 : i32
    return %c0_i32, %c0_i32_0 : i32, i32
  }
  func.func @transform_3(%arg0: i32) -> (i32, i32) {
    %c0_i32 = arith.constant 0 : i32
    %c0_i32_0 = arith.constant 0 : i32
    %c0_i32_1 = arith.constant 0 : i32
    return %c0_i32, %c0_i32_0 : i32, i32
  }
  func.func @transform_4(%arg0: i32) -> (i32, i32) {
    %c0_i32 = arith.constant 0 : i32
    %c0_i32_0 = arith.constant 0 : i32
    %c0_i32_1 = arith.constant 0 : i32
    return %c0_i32, %c0_i32_0 : i32, i32
  }
  func.func @transform_5(%arg0: i32) -> (i32, i32) {
    %c0_i32 = arith.constant 0 : i32
    %c0_i32_0 = arith.constant 0 : i32
    %c0_i32_1 = arith.constant 0 : i32
    return %c0_i32, %c0_i32_0 : i32, i32
  }
  func.func @transform_6(%arg0: i32) -> (i32, i32) {
    %c0_i32 = arith.constant 0 : i32
    %c0_i32_0 = arith.constant 0 : i32
    %c0_i32_1 = arith.constant 0 : i32
    return %c0_i32, %c0_i32_0 : i32, i32
  }
  func.func @transform_7(%arg0: i32) -> (i32, i32) {
    %c0_i32 = arith.constant 0 : i32
    %c0_i32_0 = arith.constant 0 : i32
    return %arg0, %c0_i32 : i32, i32
  }
}

</mosaic_0001>

<bundles_post_ra>
// kernel: tpu_custom_call.1
= control target key start
LH: loop header
LB: loop body
LE: loop exit
PB: predicated region body
PF: predicated region fallthrough
CT: control target
= control target key end

     0   :  { %12 = vsyncpa [#allocation3], 0  ;;  %s4048_s0 = inlined_call_operand.hbm [shape: f32[8,784], index: 0, kind: input, shape index: {}]   ;;  %s4049_s1 = inlined_call_operand.hbm [shape: bf16[784,512], index: 1, kind: input, shape index: {}]   ;;  %s4050_s2 = inlined_call_operand.hbm [shape: f32[1,512], index: 2, kind: input, shape index: {}]   ;;  %s4051_s3 = inlined_call_operand.hbm [shape: bf16[512,256], index: 3, kind: input, shape index: {}]   ;;  %s4052_s4 = inlined_call_operand.vmem [shape: f32[1,256], index: 4, kind: input, shape index: {}]   ;;  %s4053_s5 = inlined_call_operand.hbm [shape: bf16[256,128], index: 5, kind: input, shape index: {}]   ;;  %s4054_s6 = inlined_call_operand.vmem [shape: f32[1,128], index: 6, kind: input, shape index: {}]   ;;  %s4055_s7 = inlined_call_operand.hbm [shape: bf16[8,128], index: 7, kind: output, shape index: {}]  }
   0x1   :  { %13 = vsyncpa [#allocation6], 0 }
   0x2   :  { %14 = vsyncpa [#allocation9], 0  ;;  %s31_s26 = sshll.u32 %s4049_s1, 4  ;;  %s32_s26 = int_to_ptr.hbm [resolvable:$true] %s31_s26 }
   0x3   :  { %15 = vsyncpa [#allocation4], 0  ;;  %s3904_s27 = smov [#allocation5]   ;;  %s55_s8 = sshll.u32 %s4051_s3, 4  ;;  %s56_s8 = int_to_ptr.hbm [resolvable:$true] %s55_s8 }
   0x4   :  { %s33_s28 = sshll.u32 %s3904_s27, 4  ;;  %s3905_s9 = smov 256   ;;  %s34_s28 = int_to_ptr.vmem [resolvable:$true] %s33_s28 }
   0x5   :  { %s3906_s10 = smov 16   ;;  %s3907_s11 = smov [#allocation8]  }
   0x6   :  { %39 = dma.hbm_to_vmem [thread:$0]  %s32_s26, 25088, %s34_s28, [#allocation6], %s3905_s9, %s3905_s9, %s3906_s10  }
   0x7   :  { %s57_s12 = sshll.u32 %s3907_s11, 4  ;;  %s3908_s13 = smov 128   ;;  %s58_s12 = int_to_ptr.vmem [resolvable:$true] %s57_s12 }
   0x8   :  { %s3909_s14 = smov 8   ;;  %s21_s16 = sshll.u32 %s4048_s0, 4  ;;  %s22_s16 = int_to_ptr.hbm [resolvable:$true] %s21_s16 }
   0x9   :  { %63 = dma.hbm_to_vmem [thread:$0]  %s56_s8, 8192, %s58_s12, [#allocation9], %s3908_s13, %s3908_s13, %s3909_s14  }
   0xa   :  { %s3910_s17 = smov [#allocation2]   ;;  %s45_s20 = sshll.u32 %s4050_s2, 4  ;;  %s46_s20 = int_to_ptr.hbm [resolvable:$true] %s45_s20 }
   0xb   :  { %s23_s18 = sshll.u32 %s3910_s17, 4  ;;  %s3911_s21 = smov [#allocation7]   ;;  %s24_s18 = int_to_ptr.vmem [resolvable:$true] %s23_s18 }
   0xc   :  { %26 = dma.hbm_to_vmem [thread:$0]  %s22_s16, 896, %s24_s18, [#allocation3]  }
   0xd   :  { %s47_s22 = sshll.u32 %s3911_s21, 4  ;;  %s70_s25 = sshll.u32 %s4053_s5, 4  ;;  %s48_s22 = int_to_ptr.vmem [resolvable:$true] %s47_s22  ;;  %s71_s25 = int_to_ptr.hbm [resolvable:$true] %s70_s25 }
   0xe   :  { %50 = dma.hbm_to_vmem [thread:$0]  %s46_s20, 64, %s48_s22, [#allocation6]  }
   0xf   :  { %s3912_s0 = smov [#allocation10]   ;;  %s3913_s27 = smov 64  }
  0x10   :  { %s72_s26 = sshll.u32 %s3912_s0, 4  ;;  %s3914_s28 = smov 4   ;;  %s73_s26 = int_to_ptr.vmem [resolvable:$true] %s72_s26 }
  0x11   :  { %78 = dma.hbm_to_vmem [thread:$0]  %s71_s25, 2048, %s73_s26, [#allocation9], %s3913_s27, %s3913_s27, %s3914_s28  }
  0x12   :  { %3896 = dma.done.wait [#allocation3], 896  }
  0x13   :  { %3897 = vsyncadd [#allocation3], 4294966400 }
  0x14   :  { %3898 = dma.done.wait [#allocation6], 25152  }
  0x15   :  { %3899 = vsyncadd [#allocation6], 4294942144 }
  0x16   :  { %3900 = dma.done.wait [#allocation9], 10240  }
  0x17   :  { %3901 = vsyncadd [#allocation9], 4294957056  ;;  %v2469_v0 = vld [vmem:[#allocation5 + $0xe0] sm:$0xf]  ;;  %v3493_v1 = vld [vmem:[#allocation5 + $0xec] sm:$0xf0] }
  0x18   :  { %v2597_v2 = vld [vmem:[#allocation5 + $0x1e0] sm:$0xf]  ;;  %v2470_v3 = vor.u32 %v3493_v1, %v2469_v0  ;;  %v3525_v4 = vld [vmem:[#allocation5 + $0x1ec] sm:$0xf0]  ;;  %vm1302_vm0 = vcmask 130048   ;;  %s3915_s30 = smov [#allocation11]  }
  0x19   :  { %v2725_v5 = vld [vmem:[#allocation5 + $0x2e0] sm:$0xf]  ;;  %v3557_v6 = vld [vmem:[#allocation5 + $0x2ec] sm:$0xf0]  ;;  %v2598_v7 = vor.u32 %v3525_v4, %v2597_v2  ;;  %s2341_s8 = sshll.u32 %s3915_s30, 4  ;;  %s2343_s11 = sshll.u32 %s4055_s7, 4  ;;  %s2342_s8 = int_to_ptr.vmem [resolvable:$true] %s2341_s8  ;;  %s2344_s11 = int_to_ptr.hbm [resolvable:$true] %s2343_s11 }
  0x1a   :  { %v2726_v8 = vor.u32 %v3557_v6, %v2725_v5  ;;  %v2853_v9 = vld [vmem:[#allocation5 + $0x3e0] sm:$0xf]  ;;  %v3589_v10 = vld [vmem:[#allocation5 + $0x3ec] sm:$0xf0]  ;;  %1306 = vmatpush.bf16.msra.mxu0 %v2470_v3 }
  0x1b   :  { %v2453_v11 = vld [vmem:[#allocation5 + $0xc0] sm:$0xf]  ;;  %v2854_v12 = vor.u32 %v3589_v10, %v2853_v9  ;;  %v3489_v13 = vld [vmem:[#allocation5 + $0xcc] sm:$0xf0]  ;;  %1319 = vmatpush.bf16.msra.mxu1 %v2598_v7 }
  0x1c   :  { %v2581_v14 = vld [vmem:[#allocation5 + $0x1c0] sm:$0xf]  ;;  %v3521_v15 = vld [vmem:[#allocation5 + $0x1cc] sm:$0xf0]  ;;  %1332 = vmatpush.bf16.msra.mxu2 %v2726_v8  ;;  %v2454_v16 = vor.u32 %v3489_v13, %v2453_v11 }
  0x1d   :  { %v2582_v17 = vor.u32 %v3521_v15, %v2581_v14  ;;  %v2709_v18 = vld [vmem:[#allocation5 + $0x2c0] sm:$0xf]  ;;  %v3553_v19 = vld [vmem:[#allocation5 + $0x2cc] sm:$0xf0]  ;;  %1345 = vmatpush.bf16.msra.mxu3 %v2854_v12 }
  0x1e   :  { %v2837_v20 = vld [vmem:[#allocation5 + $0x3c0] sm:$0xf]  ;;  %v2710_v21 = vor.u32 %v3553_v19, %v2709_v18  ;;  %v3585_v22 = vld [vmem:[#allocation5 + $0x3cc] sm:$0xf0]  ;;  %1307 = vmatpush.bf16.msra.mxu0 %v2454_v16 }
  0x1f   :  { %v2437_v23 = vld [vmem:[#allocation5 + $0xa0] sm:$0xf]  ;;  %v3485_v24 = vld [vmem:[#allocation5 + $0xac] sm:$0xf0]  ;;  %v2838_v25 = vor.u32 %v3585_v22, %v2837_v20  ;;  %1320 = vmatpush.bf16.msra.mxu1 %v2582_v17 }
  0x20   :  { %v2565_v26 = vld [vmem:[#allocation5 + $0x1a0] sm:$0xf]  ;;  %v3517_v27 = vld [vmem:[#allocation5 + $0x1ac] sm:$0xf0]  ;;  %v2438_v29 = vor.u32 %v3485_v24, %v2437_v23  ;;  %1333 = vmatpush.bf16.msra.mxu2 %v2710_v21 }
  0x21   :  { %v2693_v28 = vld [vmem:[#allocation5 + $0x2a0] sm:$0xf]  ;;  %v3549_v30 = vld [vmem:[#allocation5 + $0x2ac] sm:$0xf0]  ;;  %v2566_v33 = vor.u32 %v3517_v27, %v2565_v26  ;;  %1346 = vmatpush.bf16.msra.mxu3 %v2838_v25 }
  0x22   :  { %v2821_v31 = vld [vmem:[#allocation5 + $0x3a0] sm:$0xf]  ;;  %v3581_v32 = vld [vmem:[#allocation5 + $0x3ac] sm:$0xf0]  ;;  %v2694_v34 = vor.u32 %v3549_v30, %v2693_v28  ;;  %1308 = vmatpush.bf16.msra.mxu0 %v2438_v29 }
  0x23   :  { %v2421_v35 = vld [vmem:[#allocation5 + $0x80] sm:$0xf]  ;;  %v3481_v36 = vld [vmem:[#allocation5 + $0x8c] sm:$0xf0]  ;;  %v2822_v38 = vor.u32 %v3581_v32, %v2821_v31  ;;  %1321 = vmatpush.bf16.msra.mxu1 %v2566_v33  ;;  %v3491_v33 = vld [vmem:[#allocation5 + $0xe4] sm:$0xf] }
  0x24   :  { %v2549_v37 = vld [vmem:[#allocation5 + $0x180] sm:$0xf]  ;;  %v3513_v39 = vld [vmem:[#allocation5 + $0x18c] sm:$0xf0]  ;;  %v2422_v44 = vor.u32 %v3481_v36, %v2421_v35  ;;  %1334 = vmatpush.bf16.msra.mxu2 %v2694_v34  ;;  %v2471_v34 = vld [vmem:[#allocation5 + $0xf0] sm:$0xf0] }
  0x25   :  { %v2677_v40 = vld [vmem:[#allocation5 + $0x280] sm:$0xf]  ;;  %v3545_v41 = vld [vmem:[#allocation5 + $0x28c] sm:$0xf0]  ;;  %v2550_v45 = vor.u32 %v3513_v39, %v2549_v37  ;;  %1347 = vmatpush.bf16.msra.mxu3 %v2822_v38  ;;  %v104_v35 = vld [vmem:[#allocation2 + $0x10] sm:$0xff] }
  0x26   :  { %v2805_v42 = vld [vmem:[#allocation5 + $0x380] sm:$0xf]  ;;  %v3577_v43 = vld [vmem:[#allocation5 + $0x38c] sm:$0xf0]  ;;  %v2678_v46 = vor.u32 %v3545_v41, %v2677_v40  ;;  %1309 = vmatpush.bf16.msra.mxu0 %v2422_v44  ;;  %v102_v40 = vld [vmem:[#allocation2] sm:$0xff] }
  0x27   :  { %v2405_v47 = vld [vmem:[#allocation5 + $0x60] sm:$0xf]  ;;  %v3477_v48 = vld [vmem:[#allocation5 + $0x6c] sm:$0xf0]  ;;  %v2806_v50 = vor.u32 %v3577_v43, %v2805_v42  ;;  %1322 = vmatpush.bf16.msra.mxu1 %v2550_v45  ;;  %v3523_v43 = vld [vmem:[#allocation5 + $0x1e4] sm:$0xf] }
  0x28   :  { %v2533_v49 = vld [vmem:[#allocation5 + $0x160] sm:$0xf]  ;;  %v3509_v51 = vld [vmem:[#allocation5 + $0x16c] sm:$0xf0]  ;;  %v2406_v56 = vor.u32 %v3477_v48, %v2405_v47  ;;  %1335 = vmatpush.bf16.msra.mxu2 %v2678_v46  ;;  %v2599_v44 = vld [vmem:[#allocation5 + $0x1f0] sm:$0xf0]  ;;  %v2474_v47 = vor.u32 %v3491_v33, %v2471_v34 }
  0x29   :  { %v2661_v52 = vld [vmem:[#allocation5 + $0x260] sm:$0xf]  ;;  %v3541_v53 = vld [vmem:[#allocation5 + $0x26c] sm:$0xf0]  ;;  %v2534_v57 = vor.u32 %v3509_v51, %v2533_v49  ;;  %1348 = vmatpush.bf16.msra.mxu3 %v2806_v50  ;;  %v3971_v51 = vpack.c.bf16 %v104_v35, %v104_v35  ;;  %v3507_v35 = vld [vmem:[#allocation5 + $0x164] sm:$0xf] }
  0x2a   :  { %v2789_v54 = vld [vmem:[#allocation5 + $0x360] sm:$0xf]  ;;  %v3573_v55 = vld [vmem:[#allocation5 + $0x36c] sm:$0xf0]  ;;  %v2662_v58 = vor.u32 %v3541_v53, %v2661_v52  ;;  %1310 = vmatpush.bf16.msra.mxu0 %v2406_v56  ;;  %v3487_v53 = vld [vmem:[#allocation5 + $0xc4] sm:$0xf] }
  0x2b   :  { %v2389_v59 = vld [vmem:[#allocation5 + $0x40] sm:$0xf]  ;;  %v3473_v60 = vld [vmem:[#allocation5 + $0x4c] sm:$0xf0]  ;;  %v2790_v62 = vor.u32 %v3573_v55, %v2789_v54  ;;  %1323 = vmatpush.bf16.msra.mxu1 %v2534_v57  ;;  %v2455_v54 = vld [vmem:[#allocation5 + $0xd0] sm:$0xf0]  ;;  %v3973_v55 = vpack.c.bf16 %v102_v40, %v102_v40 }
  0x2c   :  { %v2517_v61 = vld [vmem:[#allocation5 + $0x140] sm:$0xf]  ;;  %v3505_v63 = vld [vmem:[#allocation5 + $0x14c] sm:$0xf0]  ;;  %v2390_v4 = vor.u32 %v3473_v60, %v2389_v59  ;;  %1336 = vmatpush.bf16.msra.mxu2 %v2662_v58  ;;  %v2602_v59 = vor.u32 %v3523_v43, %v2599_v44  ;;  %v3471_v43 = vld [vmem:[#allocation5 + $0x44] sm:$0xf] }
  0x2d   :  { %v2645_v0 = vld [vmem:[#allocation5 + $0x240] sm:$0xf]  ;;  %v3537_v1 = vld [vmem:[#allocation5 + $0x24c] sm:$0xf0]  ;;  %v2518_v5 = vor.u32 %v3505_v63, %v2517_v61  ;;  %1349 = vmatpush.bf16.msra.mxu3 %v2790_v62  ;;  %v3519_v61 = vld [vmem:[#allocation5 + $0x1c4] sm:$0xf] }
  0x2e   :  { %v2773_v2 = vld [vmem:[#allocation5 + $0x340] sm:$0xf]  ;;  %v3569_v3 = vld [vmem:[#allocation5 + $0x34c] sm:$0xf0]  ;;  %v2646_v6 = vor.u32 %v3537_v1, %v2645_v0  ;;  %1311 = vmatpush.bf16.msra.mxu0 %v2390_v4  ;;  %v2583_v62 = vld [vmem:[#allocation5 + $0x1d0] sm:$0xf0]  ;;  %v2458_v0 = vor.u32 %v3487_v53, %v2455_v54 }
  0x2f   :  { %v2373_v7 = vld [vmem:[#allocation5 + $0x20] sm:$0xf]  ;;  %v3469_v8 = vld [vmem:[#allocation5 + $0x2c] sm:$0xf0]  ;;  %v2774_v10 = vor.u32 %v3569_v3, %v2773_v2  ;;  %1324 = vmatpush.bf16.msra.mxu1 %v2518_v5  ;;  %v2391_v44 = vld [vmem:[#allocation5 + $0x50] sm:$0xf0] }
  0x30   :  { %v2501_v9 = vld [vmem:[#allocation5 + $0x120] sm:$0xf]  ;;  %v3501_v11 = vld [vmem:[#allocation5 + $0x12c] sm:$0xf0]  ;;  %v2374_v16 = vor.u32 %v3469_v8, %v2373_v7  ;;  %1337 = vmatpush.bf16.msra.mxu2 %v2646_v6  ;;  %v3483_v6 = vld [vmem:[#allocation5 + $0xa4] sm:$0xf]  ;;  %v2586_v8 = vor.u32 %v3519_v61, %v2583_v62 }
  0x31   :  { %v2629_v12 = vld [vmem:[#allocation5 + $0x220] sm:$0xf]  ;;  %v3533_v13 = vld [vmem:[#allocation5 + $0x22c] sm:$0xf0]  ;;  %v2502_v20 = vor.u32 %v3501_v11, %v2501_v9  ;;  %1350 = vmatpush.bf16.msra.mxu3 %v2774_v10  ;;  %v2439_v7 = vld [vmem:[#allocation5 + $0xb0] sm:$0xf0] }
  0x32   :  { %v2757_v14 = vld [vmem:[#allocation5 + $0x320] sm:$0xf]  ;;  %v3565_v15 = vld [vmem:[#allocation5 + $0x32c] sm:$0xf0]  ;;  %v2630_v21 = vor.u32 %v3533_v13, %v2629_v12  ;;  %1312 = vmatpush.bf16.msra.mxu0 %v2374_v16  ;;  %v3515_v10 = vld [vmem:[#allocation5 + $0x1a4] sm:$0xf]  ;;  %v2442_v13 = vor.u32 %v3483_v6, %v2439_v7 }
  0x33   :  { %v2357_v17 = vld [vmem:[#allocation5] sm:$0xf]  ;;  %v3465_v18 = vld [vmem:[#allocation5 + $0xc] sm:$0xf0]  ;;  %v2758_v25 = vor.u32 %v3565_v15, %v2757_v14  ;;  %1325 = vmatpush.bf16.msra.mxu1 %v2502_v20  ;;  %v2567_v11 = vld [vmem:[#allocation5 + $0x1b0] sm:$0xf0] }
  0x34   :  { %v2485_v19 = vld [vmem:[#allocation5 + $0x100] sm:$0xf]  ;;  %v3497_v22 = vld [vmem:[#allocation5 + $0x10c] sm:$0xf0]  ;;  %v2358_v32 = vor.u32 %v3465_v18, %v2357_v17  ;;  %1338 = vmatpush.bf16.msra.mxu2 %v2630_v21  ;;  %v3479_v18 = vld [vmem:[#allocation5 + $0x84] sm:$0xf]  ;;  %v2570_v20 = vor.u32 %v3515_v10, %v2567_v11 }
  0x35   :  { %v2613_v23 = vld [vmem:[#allocation5 + $0x200] sm:$0xf]  ;;  %v3529_v24 = vld [vmem:[#allocation5 + $0x20c] sm:$0xf0]  ;;  %v2486_v36 = vor.u32 %v3497_v22, %v2485_v19  ;;  %1351 = vmatpush.bf16.msra.mxu3 %v2758_v25  ;;  %v2423_v19 = vld [vmem:[#allocation5 + $0x90] sm:$0xf0] }
  0x36   :  { %v2741_v26 = vld [vmem:[#allocation5 + $0x300] sm:$0xf]  ;;  %v3561_v27 = vld [vmem:[#allocation5 + $0x30c] sm:$0xf0]  ;;  %v2614_v37 = vor.u32 %v3529_v24, %v2613_v23  ;;  %1313 = vmatpush.bf16.msra.mxu0 %v2358_v32  ;;  %v3511_v22 = vld [vmem:[#allocation5 + $0x184] sm:$0xf]  ;;  %v2426_v25 = vor.u32 %v3479_v18, %v2423_v19 }
  0x37   :  { %v2981_v28 = vld [vmem:[#allocation5 + $0x4e0] sm:$0xf]  ;;  %v3621_v29 = vld [vmem:[#allocation5 + $0x4ec] sm:$0xf0]  ;;  %v2742_v41 = vor.u32 %v3561_v27, %v2741_v26  ;;  %1326 = vmatpush.bf16.msra.mxu1 %v2486_v36  ;;  %v2551_v23 = vld [vmem:[#allocation5 + $0x190] sm:$0xf0] }
  0x38   :  { %v3109_v30 = vld [vmem:[#allocation5 + $0x5e0] sm:$0xf]  ;;  %v3653_v31 = vld [vmem:[#allocation5 + $0x5ec] sm:$0xf0]  ;;  %v2982_v42 = vor.u32 %v3621_v29, %v2981_v28  ;;  %1339 = vmatpush.bf16.msra.mxu2 %v2614_v37  ;;  %v108_v32 = vld [vmem:[#allocation2 + $0x30] sm:$0xff]  ;;  %v2554_v33 = vor.u32 %v3511_v22, %v2551_v23 }
  0x39   :  { %v3125_v38 = vld [vmem:[#allocation5 + $0x600] sm:$0xf]  ;;  %v3657_v39 = vld [vmem:[#allocation5 + $0x60c] sm:$0xf0]  ;;  %v3110_v46 = vor.u32 %v3653_v31, %v3109_v30  ;;  %1352 = vmatpush.bf16.msra.mxu3 %v2742_v41  ;;  %1314 = vmatmul.bf16.vlgmr.msra.gmra.mxu0 %v3973_v55  ;;  %v3475_v30 = vld [vmem:[#allocation5 + $0x64] sm:$0xf] }
  0x3a   :  { %v105_v45 = vld [vmem:[#allocation2 + $0x18] sm:$0xff]  ;;  %v3617_v49 = vld [vmem:[#allocation5 + $0x4cc] sm:$0xf0]  ;;  %v3126_v56 = vor.u32 %v3657_v39, %v3125_v38  ;;  %1358 = vmatpush.bf16.msrb.mxu0 %v2982_v42  ;;  %v2407_v31 = vld [vmem:[#allocation5 + $0x70] sm:$0xf0] }
  0x3b   :  { %v2965_v48 = vld [vmem:[#allocation5 + $0x4c0] sm:$0xf]  ;;  %v3649_v52 = vld [vmem:[#allocation5 + $0x5cc] sm:$0xf0]  ;;  %v3975_v57 = vpack.c.bf16 %v105_v45, %v105_v45  ;;  %1371 = vmatpush.bf16.msrb.mxu1 %v3110_v46  ;;  %1340 = vmatmul.bf16.vlgmr.msra.gmra.mxu2 %v3971_v51  ;;  %v2535_v36 = vld [vmem:[#allocation5 + $0x170] sm:$0xf0]  ;;  %v2410_v38 = vor.u32 %v3475_v30, %v2407_v31  ;;  %v3983_v45 = vpack.c.bf16 %v108_v32, %v108_v32 }
  0x3c   :  { %v3093_v50 = vld [vmem:[#allocation5 + $0x5c0] sm:$0xf]  ;;  %v103_v58 = vld [vmem:[#allocation2 + $0x8] sm:$0xff]  ;;  %v2966_v60 = vor.u32 %v3617_v49, %v2965_v48  ;;  %1391 = vmatpush.bf16.msrb.mxu2 %v3126_v56  ;;  %v2538_v46 = vor.u32 %v3507_v35, %v2535_v36  ;;  %v3503_v48 = vld [vmem:[#allocation5 + $0x144] sm:$0xf] }
  0x3d   :  { %1397 = vmatpush.bf16.msrb.mxu3 %v2474_v47  ;;  %v3094_v63 = vor.u32 %v3649_v52, %v3093_v50  ;;  %v2949_v1 = vld [vmem:[#allocation5 + $0x4a0] sm:$0xf]  ;;  %v3613_v2 = vld [vmem:[#allocation5 + $0x4ac] sm:$0xf0]  ;;  %v3979_v4 = vpack.c.bf16 %v103_v58, %v103_v58  ;;  %v2519_v49 = vld [vmem:[#allocation5 + $0x150] sm:$0xf0]  ;;  %v2394_v52 = vor.u32 %v3471_v43, %v2391_v44 }
  0x3e   :  { %v3077_v3 = vld [vmem:[#allocation5 + $0x5a0] sm:$0xf]  ;;  %v3645_v5 = vld [vmem:[#allocation5 + $0x5ac] sm:$0xf0]  ;;  %1353 = vmatmul.bf16.vlgmr.msra.gmra.mxu3 %v3975_v57  ;;  %1359 = vmatpush.bf16.msrb.mxu0 %v2966_v60  ;;  %v2950_v9 = vor.u32 %v3613_v2, %v2949_v1  ;;  %v2375_v60 = vld [vmem:[#allocation5 + $0x30] sm:$0xf0]  ;;  %v2522_v61 = vor.u32 %v3503_v48, %v2519_v49 }
  0x3f   :  { %1372 = vmatpush.bf16.msrb.mxu1 %v3094_v63  ;;  %v3078_v12 = vor.u32 %v3645_v5, %v3077_v3  ;;  %v2933_v14 = vld [vmem:[#allocation5 + $0x480] sm:$0xf]  ;;  %v3609_v15 = vld [vmem:[#allocation5 + $0x48c] sm:$0xf0]  ;;  %v3499_v63 = vld [vmem:[#allocation5 + $0x124] sm:$0xf] }
  0x40   :  { %1410 = vmatpush.bf16.msra.mxu2 %v2602_v59  ;;  %v3061_v16 = vld [vmem:[#allocation5 + $0x580] sm:$0xf]  ;;  %1327 = vmatmul.bf16.vlgmr.msra.gmra.mxu1 %v3979_v4  ;;  %v3641_v17 = vld [vmem:[#allocation5 + $0x58c] sm:$0xf0]  ;;  %v2934_v21 = vor.u32 %v3609_v15, %v2933_v14  ;;  %v3467_v59 = vld [vmem:[#allocation5 + $0x24] sm:$0xf] }
  0x41   :  { %1398 = vmatpush.bf16.msrb.mxu3 %v2458_v0  ;;  %v3062_v24 = vor.u32 %v3641_v17, %v3061_v16  ;;  %v2917_v26 = vld [vmem:[#allocation5 + $0x460] sm:$0xf]  ;;  %v3605_v27 = vld [vmem:[#allocation5 + $0x46c] sm:$0xf0]  ;;  %v2503_v0 = vld [vmem:[#allocation5 + $0x130] sm:$0xf0]  ;;  %v2378_v3 = vor.u32 %v3467_v59, %v2375_v60 }
  0x42   :  { %1360 = vmatpush.bf16.msrb.mxu0 %v2950_v9  ;;  %v3045_v28 = vld [vmem:[#allocation5 + $0x560] sm:$0xf]  ;;  %v3637_v29 = vld [vmem:[#allocation5 + $0x56c] sm:$0xf0]  ;;  %v2918_v34 = vor.u32 %v3605_v27, %v2917_v26  ;;  %v2359_v9 = vld [vmem:[#allocation5 + $0x10] sm:$0xf0]  ;;  %v2506_v14 = vor.u32 %v3499_v63, %v2503_v0 }
  0x43   :  { %1373 = vmatpush.bf16.msrb.mxu1 %v3078_v12  ;;  %v3046_v37 = vor.u32 %v3637_v29, %v3045_v28  ;;  %v2901_v39 = vld [vmem:[#allocation5 + $0x440] sm:$0xf]  ;;  %v3601_v40 = vld [vmem:[#allocation5 + $0x44c] sm:$0xf0]  ;;  %v3555_v10 = vld [vmem:[#allocation5 + $0x2e4] sm:$0xf] }
  0x44   :  { %1411 = vmatpush.bf16.msra.mxu2 %v2586_v8  ;;  %v3029_v41 = vld [vmem:[#allocation5 + $0x540] sm:$0xf]  ;;  %v3633_v42 = vld [vmem:[#allocation5 + $0x54c] sm:$0xf0]  ;;  %v2902_v47 = vor.u32 %v3601_v40, %v2901_v39  ;;  %v3463_v8 = vld [vmem:[#allocation5 + $0x4] sm:$0xf] }
  0x45   :  { %1399 = vmatpush.bf16.msrb.mxu3 %v2442_v13  ;;  %v3030_v50 = vor.u32 %v3633_v42, %v3029_v41  ;;  %v2885_v53 = vld [vmem:[#allocation5 + $0x420] sm:$0xf]  ;;  %v3597_v54 = vld [vmem:[#allocation5 + $0x42c] sm:$0xf0]  ;;  %v2727_v11 = vld [vmem:[#allocation5 + $0x2f0] sm:$0xf0] }
  0x46   :  { %1361 = vmatpush.bf16.msrb.mxu0 %v2934_v21  ;;  %v3013_v56 = vld [vmem:[#allocation5 + $0x520] sm:$0xf]  ;;  %v3629_v58 = vld [vmem:[#allocation5 + $0x52c] sm:$0xf0]  ;;  %v2886_v62 = vor.u32 %v3597_v54, %v2885_v53  ;;  %v3587_v12 = vld [vmem:[#allocation5 + $0x3e4] sm:$0xf] }
  0x47   :  { %1374 = vmatpush.bf16.msrb.mxu1 %v3062_v24  ;;  %v2869_v1 = vld [vmem:[#allocation5 + $0x400] sm:$0xf]  ;;  %v3014_v2 = vor.u32 %v3629_v58, %v3013_v56  ;;  %v3593_v5 = vld [vmem:[#allocation5 + $0x40c] sm:$0xf0]  ;;  %v2855_v13 = vld [vmem:[#allocation5 + $0x3f0] sm:$0xf0]  ;;  %v2730_v24 = vor.u32 %v3555_v10, %v2727_v11 }
  0x48   :  { %1412 = vmatpush.bf16.msra.mxu2 %v2570_v20  ;;  %v2997_v6 = vld [vmem:[#allocation5 + $0x500] sm:$0xf]  ;;  %v3625_v7 = vld [vmem:[#allocation5 + $0x50c] sm:$0xf0]  ;;  %v2870_v15 = vor.u32 %v3593_v5, %v2869_v1  ;;  %v3619_v16 = vld [vmem:[#allocation5 + $0x4e4] sm:$0xf]  ;;  %v2362_v20 = vor.u32 %v3463_v8, %v2359_v9 }
  0x49   :  { %1400 = vmatpush.bf16.msrb.mxu3 %v2426_v25  ;;  %v2983_v17 = vld [vmem:[#allocation5 + $0x4f0] sm:$0xf0]  ;;  %v106_v18 = vld [vmem:[#allocation2 + $0x20] sm:$0xff]  ;;  %v2998_v19 = vor.u32 %v3625_v7, %v2997_v6  ;;  %v3495_v21 = vld [vmem:[#allocation5 + $0x104] sm:$0xf]  ;;  %v2858_v25 = vor.u32 %v3587_v12, %v2855_v13 }
  0x4a   :  { %1362 = vmatpush.bf16.msrb.mxu0 %v2918_v34  ;;  %v2487_v22 = vld [vmem:[#allocation5 + $0x110] sm:$0xf0]  ;;  %v3651_v26 = vld [vmem:[#allocation5 + $0x5e4] sm:$0xf]  ;;  %v2986_v29 = vor.u32 %v3619_v16, %v2983_v17  ;;  %v3987_v30 = vpack.c.bf16 %v106_v18, %v106_v18 }
  0x4b   :  { %1375 = vmatpush.bf16.msrb.mxu1 %v3046_v37  ;;  %3139 = vmatmul.msk.bf16.vlgmr.msrb.gmra.mxu2 %vm1302_vm0, %v3983_v45  ;;  %v107_v23 = vld [vmem:[#allocation2 + $0x28] sm:$0xff]  ;;  %v3551_v28 = vld [vmem:[#allocation5 + $0x2c4] sm:$0xf]  ;;  %v2490_v34 = vor.u32 %v3495_v21, %v2487_v22 }
  0x4c   :  { %1413 = vmatpush.bf16.msra.mxu2 %v2554_v33  ;;  %v3111_v27 = vld [vmem:[#allocation5 + $0x5f0] sm:$0xf0]  ;;  %v3583_v32 = vld [vmem:[#allocation5 + $0x3c4] sm:$0xf]  ;;  %v3989_v35 = vpack.c.bf16 %v107_v23, %v107_v23 }
  0x4d   :  { %1401 = vmatpush.bf16.msrb.mxu3 %v2410_v38  ;;  %v2711_v31 = vld [vmem:[#allocation5 + $0x2d0] sm:$0xf0]  ;;  %v3615_v36 = vld [vmem:[#allocation5 + $0x4c4] sm:$0xf]  ;;  %v3114_v38 = vor.u32 %v3651_v26, %v3111_v27 }
  0x4e   :  { %1363 = vmatpush.bf16.msrb.mxu0 %v2902_v47  ;;  %v2839_v33 = vld [vmem:[#allocation5 + $0x3d0] sm:$0xf0]  ;;  %v2714_v39 = vor.u32 %v3551_v28, %v2711_v31  ;;  %v3647_v41 = vld [vmem:[#allocation5 + $0x5c4] sm:$0xf] }
  0x4f   :  { %1376 = vmatpush.bf16.msrb.mxu1 %v3030_v50  ;;  %v2967_v37 = vld [vmem:[#allocation5 + $0x4d0] sm:$0xf0]  ;;  %v2842_v40 = vor.u32 %v3583_v32, %v2839_v33  ;;  %v3547_v43 = vld [vmem:[#allocation5 + $0x2a4] sm:$0xf] }
  0x50   :  { %1414 = vmatpush.bf16.msra.mxu2 %v2538_v46  ;;  %v3095_v42 = vld [vmem:[#allocation5 + $0x5d0] sm:$0xf0]  ;;  %v2970_v44 = vor.u32 %v3615_v36, %v2967_v37  ;;  %v3579_v47 = vld [vmem:[#allocation5 + $0x3a4] sm:$0xf] }
  0x51   :  { %1402 = vmatpush.bf16.msrb.mxu3 %v2394_v52  ;;  %v2695_v46 = vld [vmem:[#allocation5 + $0x2b0] sm:$0xf0]  ;;  %v3611_v49 = vld [vmem:[#allocation5 + $0x4a4] sm:$0xf]  ;;  %v3098_v52 = vor.u32 %v3647_v41, %v3095_v42 }
  0x52   :  { %1364 = vmatpush.bf16.msrb.mxu0 %v2886_v62  ;;  %v2823_v48 = vld [vmem:[#allocation5 + $0x3b0] sm:$0xf0]  ;;  %v2698_v53 = vor.u32 %v3547_v43, %v2695_v46  ;;  %v3643_v56 = vld [vmem:[#allocation5 + $0x5a4] sm:$0xf] }
  0x53   :  { %1377 = vmatpush.bf16.msrb.mxu1 %v3014_v2  ;;  %v2951_v50 = vld [vmem:[#allocation5 + $0x4b0] sm:$0xf0]  ;;  %v2826_v54 = vor.u32 %v3579_v47, %v2823_v48  ;;  %v3543_v59 = vld [vmem:[#allocation5 + $0x284] sm:$0xf] }
  0x54   :  { %1415 = vmatpush.bf16.msra.mxu2 %v2522_v61  ;;  %v3079_v58 = vld [vmem:[#allocation5 + $0x5b0] sm:$0xf0]  ;;  %v2954_v60 = vor.u32 %v3611_v49, %v2951_v50  ;;  %v3575_v62 = vld [vmem:[#allocation5 + $0x384] sm:$0xf] }
  0x55   :  { %1403 = vmatpush.bf16.msrb.mxu3 %v2378_v3  ;;  %v2679_v61 = vld [vmem:[#allocation5 + $0x290] sm:$0xf0]  ;;  %v3607_v0 = vld [vmem:[#allocation5 + $0x484] sm:$0xf]  ;;  %v3082_v2 = vor.u32 %v3643_v56, %v3079_v58  ;;  %v2477_v56 = vld [vmem:[#allocation5 + $0xe8] sm:$0xf] }
  0x56   :  { %1365 = vmatpush.bf16.msrb.mxu0 %v2870_v15  ;;  %v2807_v63 = vld [vmem:[#allocation5 + $0x390] sm:$0xf0]  ;;  %v2682_v3 = vor.u32 %v3543_v59, %v2679_v61  ;;  %v3639_v6 = vld [vmem:[#allocation5 + $0x584] sm:$0xf]  ;;  %v3494_v58 = vld [vmem:[#allocation5 + $0xf4] sm:$0xf0] }
  0x57   :  { %1378 = vmatpush.bf16.msrb.mxu1 %v2998_v19  ;;  %v2935_v1 = vld [vmem:[#allocation5 + $0x490] sm:$0xf0]  ;;  %v2810_v5 = vor.u32 %v3575_v62, %v2807_v63  ;;  %v3539_v8 = vld [vmem:[#allocation5 + $0x264] sm:$0xf]  ;;  %v2605_v59 = vld [vmem:[#allocation5 + $0x1e8] sm:$0xf] }
  0x58   :  { %1416 = vmatpush.bf16.msra.mxu2 %v2506_v14  ;;  %v3063_v7 = vld [vmem:[#allocation5 + $0x590] sm:$0xf0]  ;;  %v2938_v9 = vor.u32 %v3607_v0, %v2935_v1  ;;  %v3571_v11 = vld [vmem:[#allocation5 + $0x364] sm:$0xf]  ;;  %v3526_v61 = vld [vmem:[#allocation5 + $0x1f4] sm:$0xf0] }
  0x59   :  { %1404 = vmatpush.bf16.msrb.mxu3 %v2362_v20  ;;  %1366 = vmatmul.bf16.vlgmr.msrb.gmra.mxu0 %v3987_v30  ;;  %v2663_v10 = vld [vmem:[#allocation5 + $0x270] sm:$0xf0]  ;;  %v3603_v13 = vld [vmem:[#allocation5 + $0x464] sm:$0xf]  ;;  %v3066_v15 = vor.u32 %v3639_v6, %v3063_v7  ;;  %v2478_v6 = vor.u32 %v3494_v58, %v2477_v56  ;;  %v2861_v7 = vld [vmem:[#allocation5 + $0x3e8] sm:$0xf] }
  0x5a   :  { %1423 = vmatpush.bf16.msra.mxu0 %v2730_v24  ;;  %1379 = vmatmul.bf16.vlgmr.msrb.gmra.mxu1 %v3989_v35  ;;  %v2791_v12 = vld [vmem:[#allocation5 + $0x370] sm:$0xf0]  ;;  %v2666_v16 = vor.u32 %v3539_v8, %v2663_v10  ;;  %v3635_v18 = vld [vmem:[#allocation5 + $0x564] sm:$0xf]  ;;  %v3590_v8 = vld [vmem:[#allocation5 + $0x3f4] sm:$0xf0]  ;;  %v2606_v10 = vor.u32 %v3526_v61, %v2605_v59 }
  0x5b   :  { %1436 = vmatpush.bf16.msra.mxu1 %v2858_v25  ;;  %v2919_v14 = vld [vmem:[#allocation5 + $0x470] sm:$0xf0]  ;;  %v2794_v17 = vor.u32 %v3571_v11, %v2791_v12  ;;  %v3535_v20 = vld [vmem:[#allocation5 + $0x244] sm:$0xf]  ;;  %v3490_v11 = vld [vmem:[#allocation5 + $0xd4] sm:$0xf0] }
  0x5c   :  { %1417 = vmatpush.bf16.msra.mxu2 %v2490_v34  ;;  %1405 = vmatmul.bf16.vlgmr.msrb.gmra.mxu3 %v3973_v55  ;;  %v3047_v19 = vld [vmem:[#allocation5 + $0x570] sm:$0xf0]  ;;  %v2922_v21 = vor.u32 %v3603_v13, %v2919_v14  ;;  %v3567_v23 = vld [vmem:[#allocation5 + $0x344] sm:$0xf]  ;;  %v2733_v13 = vld [vmem:[#allocation5 + $0x2e8] sm:$0xf] }
  0x5d   :  { %1449 = vmatpush.bf16.msra.mxu3 %v2986_v29  ;;  %v2647_v22 = vld [vmem:[#allocation5 + $0x250] sm:$0xf0]  ;;  %v3599_v25 = vld [vmem:[#allocation5 + $0x444] sm:$0xf]  ;;  %v3050_v27 = vor.u32 %v3635_v18, %v3047_v19  ;;  %v3558_v14 = vld [vmem:[#allocation5 + $0x2f4] sm:$0xf0]  ;;  %v2862_v18 = vor.u32 %v3590_v8, %v2861_v7 }
  0x5e   :  { %1424 = vmatpush.bf16.msra.mxu0 %v2714_v39  ;;  %v2775_v24 = vld [vmem:[#allocation5 + $0x350] sm:$0xf0]  ;;  %v2650_v28 = vor.u32 %v3535_v20, %v2647_v22  ;;  %v3631_v31 = vld [vmem:[#allocation5 + $0x544] sm:$0xf]  ;;  %v2845_v20 = vld [vmem:[#allocation5 + $0x3c8] sm:$0xf] }
  0x5f   :  { %1437 = vmatpush.bf16.msra.mxu1 %v2842_v40  ;;  %1418 = vmatmul.bf16.vlgmr.msra.gmra.mxu2 %v3979_v4  ;;  %v2903_v26 = vld [vmem:[#allocation5 + $0x450] sm:$0xf0]  ;;  %v2778_v29 = vor.u32 %v3567_v23, %v2775_v24  ;;  %v3531_v33 = vld [vmem:[#allocation5 + $0x224] sm:$0xf]  ;;  %v2445_v22 = vld [vmem:[#allocation5 + $0xa8] sm:$0xf]  ;;  %v2734_v23 = vor.u32 %v3558_v14, %v2733_v13 }
  0x60   :  { %1462 = vmatpush.bf16.msrb.mxu2 %v3114_v38  ;;  %v3031_v32 = vld [vmem:[#allocation5 + $0x550] sm:$0xf0]  ;;  %v2906_v34 = vor.u32 %v3599_v25, %v2903_v26  ;;  %v3563_v37 = vld [vmem:[#allocation5 + $0x324] sm:$0xf]  ;;  %v3486_v25 = vld [vmem:[#allocation5 + $0xb4] sm:$0xf0] }
  0x61   :  { %1450 = vmatpush.bf16.msra.mxu3 %v2970_v44  ;;  %v2631_v36 = vld [vmem:[#allocation5 + $0x230] sm:$0xf0]  ;;  %v3595_v39 = vld [vmem:[#allocation5 + $0x424] sm:$0xf]  ;;  %v3034_v41 = vor.u32 %v3631_v31, %v3031_v32  ;;  %v2717_v26 = vld [vmem:[#allocation5 + $0x2c8] sm:$0xf]  ;;  %v2446_v32 = vor.u32 %v3486_v25, %v2445_v22 }
  0x62   :  { %1425 = vmatpush.bf16.msra.mxu0 %v2698_v53  ;;  %v2759_v38 = vld [vmem:[#allocation5 + $0x330] sm:$0xf0]  ;;  %v3627_v42 = vld [vmem:[#allocation5 + $0x524] sm:$0xf]  ;;  %v2634_v46 = vor.u32 %v3531_v33, %v2631_v36  ;;  %v2829_v33 = vld [vmem:[#allocation5 + $0x3a8] sm:$0xf] }
  0x63   :  { %1438 = vmatpush.bf16.msra.mxu1 %v2826_v54  ;;  %v2887_v40 = vld [vmem:[#allocation5 + $0x430] sm:$0xf0]  ;;  %v3527_v44 = vld [vmem:[#allocation5 + $0x204] sm:$0xf]  ;;  %v2762_v47 = vor.u32 %v3563_v37, %v2759_v38  ;;  %v2429_v36 = vld [vmem:[#allocation5 + $0x88] sm:$0xf] }
  0x64   :  { %1463 = vmatpush.bf16.msrb.mxu2 %v3098_v52  ;;  %v3015_v43 = vld [vmem:[#allocation5 + $0x530] sm:$0xf0]  ;;  %v3559_v49 = vld [vmem:[#allocation5 + $0x304] sm:$0xf]  ;;  %v2890_v52 = vor.u32 %v3595_v39, %v2887_v40  ;;  %v3482_v39 = vld [vmem:[#allocation5 + $0x94] sm:$0xf0] }
  0x65   :  { %1451 = vmatpush.bf16.msra.mxu3 %v2954_v60  ;;  %v2615_v48 = vld [vmem:[#allocation5 + $0x210] sm:$0xf0]  ;;  %v3591_v53 = vld [vmem:[#allocation5 + $0x404] sm:$0xf]  ;;  %v3018_v60 = vor.u32 %v3627_v42, %v3015_v43  ;;  %v2701_v40 = vld [vmem:[#allocation5 + $0x2a8] sm:$0xf] }
  0x66   :  { %1426 = vmatpush.bf16.msra.mxu0 %v2682_v3  ;;  %v2743_v50 = vld [vmem:[#allocation5 + $0x310] sm:$0xf0]  ;;  %v3655_v62 = vld [vmem:[#allocation5 + $0x604] sm:$0xf]  ;;  %v2618_v0 = vor.u32 %v3527_v44, %v2615_v48  ;;  %v2557_v42 = vld [vmem:[#allocation5 + $0x188] sm:$0xf] }
  0x67   :  { %1439 = vmatpush.bf16.msra.mxu1 %v2810_v5  ;;  %v2871_v54 = vld [vmem:[#allocation5 + $0x410] sm:$0xf0]  ;;  %v2746_v1 = vor.u32 %v3559_v49, %v2743_v50  ;;  %v3514_v43 = vld [vmem:[#allocation5 + $0x194] sm:$0xf0]  ;;  %v2413_v49 = vld [vmem:[#allocation5 + $0x68] sm:$0xf] }
  0x68   :  { %1464 = vmatpush.bf16.msrb.mxu2 %v3082_v2  ;;  %v3127_v63 = vld [vmem:[#allocation5 + $0x610] sm:$0xf0]  ;;  %v3623_v2 = vld [vmem:[#allocation5 + $0x504] sm:$0xf]  ;;  %v2874_v5 = vor.u32 %v3591_v53, %v2871_v54  ;;  %v3578_v48 = vld [vmem:[#allocation5 + $0x394] sm:$0xf0] }
  0x69   :  { %1452 = vmatpush.bf16.msra.mxu3 %v2938_v9  ;;  %v2999_v3 = vld [vmem:[#allocation5 + $0x510] sm:$0xf0]  ;;  %v2461_v9 = vld [vmem:[#allocation5 + $0xc8] sm:$0xf]  ;;  %v3130_v12 = vor.u32 %v3655_v62, %v3127_v63  ;;  %v3478_v53 = vld [vmem:[#allocation5 + $0x74] sm:$0xf0] }
  0x6a   :  { %1427 = vmatpush.bf16.msra.mxu0 %v2666_v16  ;;  %v2589_v16 = vld [vmem:[#allocation5 + $0x1c8] sm:$0xf]  ;;  %v2462_v19 = vor.u32 %v3490_v11, %v2461_v9  ;;  %v3546_v56 = vld [vmem:[#allocation5 + $0x294] sm:$0xf0]  ;;  %v2414_v61 = vor.u32 %v3478_v53, %v2413_v49 }
  0x6b   :  { %1440 = vmatpush.bf16.msra.mxu1 %v2794_v17  ;;  %v3522_v17 = vld [vmem:[#allocation5 + $0x1d4] sm:$0xf0]  ;;  %v2685_v54 = vld [vmem:[#allocation5 + $0x288] sm:$0xf] }
  0x6c   :  { %1465 = vmatpush.bf16.msrb.mxu2 %v3066_v15  ;;  %v3002_v15 = vor.u32 %v3623_v2, %v2999_v3  ;;  %v2590_v24 = vor.u32 %v3522_v17, %v2589_v16  ;;  %v2541_v58 = vld [vmem:[#allocation5 + $0x168] sm:$0xf]  ;;  %v3510_v59 = vld [vmem:[#allocation5 + $0x174] sm:$0xf0] }
  0x6d   :  { %1453 = vmatpush.bf16.msra.mxu3 %v2922_v21  ;;  %v3586_v21 = vld [vmem:[#allocation5 + $0x3d4] sm:$0xf0]  ;;  %v2797_v62 = vld [vmem:[#allocation5 + $0x368] sm:$0xf]  ;;  %v2542_v2 = vor.u32 %v3510_v59, %v2541_v58 }
  0x6e   :  { %1428 = vmatpush.bf16.msra.mxu0 %v2650_v28  ;;  %v2573_v28 = vld [vmem:[#allocation5 + $0x1a8] sm:$0xf]  ;;  %v2846_v31 = vor.u32 %v3586_v21, %v2845_v20  ;;  %v3574_v63 = vld [vmem:[#allocation5 + $0x374] sm:$0xf0] }
  0x6f   :  { %1441 = vmatpush.bf16.msra.mxu1 %v2778_v29  ;;  %v3518_v29 = vld [vmem:[#allocation5 + $0x1b4] sm:$0xf0]  ;;  %v2525_v7 = vld [vmem:[#allocation5 + $0x148] sm:$0xf]  ;;  %v2798_v9 = vor.u32 %v3574_v63, %v2797_v62 }
  0x70   :  { %1466 = vmatpush.bf16.msrb.mxu2 %v3050_v27  ;;  %v3554_v27 = vld [vmem:[#allocation5 + $0x2d4] sm:$0xf0]  ;;  %v2574_v38 = vor.u32 %v3518_v29, %v2573_v28  ;;  %v2781_v11 = vld [vmem:[#allocation5 + $0x348] sm:$0xf] }
  0x71   :  { %1454 = vmatpush.bf16.msra.mxu3 %v2906_v34  ;;  %v3582_v34 = vld [vmem:[#allocation5 + $0x3b4] sm:$0xf0]  ;;  %v2718_v37 = vor.u32 %v3554_v27, %v2717_v26  ;;  %v2381_v13 = vld [vmem:[#allocation5 + $0x28] sm:$0xf] }
  0x72   :  { %1429 = vmatpush.bf16.msra.mxu0 %v2634_v46  ;;  %v2830_v44 = vor.u32 %v3582_v34, %v2829_v33  ;;  %v2430_v46 = vor.u32 %v3482_v39, %v2429_v36  ;;  %v3474_v3 = vld [vmem:[#allocation5 + $0x54] sm:$0xf0]  ;;  %v2653_v17 = vld [vmem:[#allocation5 + $0x248] sm:$0xf] }
  0x73   :  { %1442 = vmatpush.bf16.msra.mxu1 %v2762_v47  ;;  %v2813_v47 = vld [vmem:[#allocation5 + $0x388] sm:$0xf]  ;;  %v3506_v8 = vld [vmem:[#allocation5 + $0x154] sm:$0xf0] }
  0x74   :  { %1467 = vmatpush.bf16.msrb.mxu2 %v3034_v41  ;;  %v3550_v41 = vld [vmem:[#allocation5 + $0x2b4] sm:$0xf0]  ;;  %v2765_v22 = vld [vmem:[#allocation5 + $0x328] sm:$0xf] }
  0x75   :  { %1455 = vmatpush.bf16.msra.mxu3 %v2890_v52  ;;  %v2702_v50 = vor.u32 %v3550_v41, %v2701_v40  ;;  %v2558_v52 = vor.u32 %v3514_v43, %v2557_v42  ;;  %v3470_v16 = vld [vmem:[#allocation5 + $0x34] sm:$0xf0]  ;;  %v2365_v25 = vld [vmem:[#allocation5 + $0x8] sm:$0xf] }
  0x76   :  { %1430 = vmatpush.bf16.msra.mxu0 %v2618_v0  ;;  %v2397_v0 = vld [vmem:[#allocation5 + $0x48] sm:$0xf]  ;;  %v3502_v20 = vld [vmem:[#allocation5 + $0x134] sm:$0xf0] }
  0x77   :  { %1443 = vmatpush.bf16.msra.mxu1 %v2746_v1  ;;  %v2686_v1 = vor.u32 %v3546_v56, %v2685_v54  ;;  %v3466_v26 = vld [vmem:[#allocation5 + $0x14] sm:$0xf0]  ;;  %v2493_v29 = vld [vmem:[#allocation5 + $0x108] sm:$0xf] }
  0x78   :  { %1468 = vmatpush.bf16.msrb.mxu2 %v3018_v60  ;;  %v2814_v60 = vor.u32 %v3578_v48, %v2813_v47  ;;  %v3498_v33 = vld [vmem:[#allocation5 + $0x114] sm:$0xf0]  ;;  %v2989_v34 = vld [vmem:[#allocation5 + $0x4e8] sm:$0xf]  ;;  %v2366_v41 = vor.u32 %v3466_v26, %v2365_v25  ;;  %v3480_v25 = vld [vmem:[#allocation5 + $0x8c] sm:$0xf] }
  0x79   :  { %1456 = vmatpush.bf16.msra.mxu3 %v2874_v5  ;;  %1431 = vmatmul.bf16.vlgmr.msra.gmra.mxu0 %v3971_v51  ;;  %v2669_v5 = vld [vmem:[#allocation5 + $0x268] sm:$0xf]  ;;  %v3622_v36 = vld [vmem:[#allocation5 + $0x4f4] sm:$0xf0]  ;;  %v2494_v47 = vor.u32 %v3498_v33, %v2493_v29  ;;  %v3516_v29 = vld [vmem:[#allocation5 + $0x1ac] sm:$0xf] }
  0x7a   :  { %1482 = vmatpush.bf16.msrb.mxu0 %v3130_v12  ;;  %1444 = vmatmul.bf16.vlgmr.msra.gmra.mxu1 %v3975_v57  ;;  %v3570_v12 = vld [vmem:[#allocation5 + $0x354] sm:$0xf0]  ;;  %v2749_v40 = vld [vmem:[#allocation5 + $0x308] sm:$0xf]  ;;  %v2990_v48 = vor.u32 %v3622_v36, %v2989_v34 }
  0x7b   :  { %1488 = vmatpush.bf16.msrb.mxu1 %v2478_v6  ;;  %v3542_v6 = vld [vmem:[#allocation5 + $0x274] sm:$0xf0]  ;;  %v2782_v21 = vor.u32 %v3570_v12, %v2781_v11  ;;  %v2973_v49 = vld [vmem:[#allocation5 + $0x4c8] sm:$0xf] }
  0x7c   :  { %1469 = vmatpush.bf16.msrb.mxu2 %v3002_v15  ;;  %1457 = vmatmul.bf16.vlgmr.msra.gmra.mxu3 %v3987_v30  ;;  %v2670_v14 = vor.u32 %v3542_v6, %v2669_v5  ;;  %v2526_v15 = vor.u32 %v3506_v8, %v2525_v7  ;;  %v3654_v39 = vld [vmem:[#allocation5 + $0x5f4] sm:$0xf0]  ;;  %v3133_v56 = vld [vmem:[#allocation5 + $0x608] sm:$0xf]  ;;  %v3524_v5 = vld [vmem:[#allocation5 + $0x1ec] sm:$0xf] }
  0x7d   :  { %1501 = vmatpush.bf16.msrb.mxu3 %v2606_v10  ;;  %v2398_v10 = vor.u32 %v3474_v3, %v2397_v0  ;;  %v3562_v42 = vld [vmem:[#allocation5 + $0x314] sm:$0xf0]  ;;  %v3488_v0 = vld [vmem:[#allocation5 + $0xcc] sm:$0xf]  ;;  %v2607_v6 = vld [vmem:[#allocation5 + $0x1f8] sm:$0xf0] }
  0x7e   :  { %1514 = vmatpush.bf16.msra.mxu0 %v2734_v23  ;;  %v2382_v23 = vor.u32 %v3470_v16, %v2381_v13  ;;  %v3618_v54 = vld [vmem:[#allocation5 + $0x4d4] sm:$0xf0]  ;;  %v2750_v59 = vor.u32 %v3562_v42, %v2749_v40  ;;  %v2957_v8 = vld [vmem:[#allocation5 + $0x4a8] sm:$0xf]  ;;  %v3484_v13 = vld [vmem:[#allocation5 + $0xac] sm:$0xf] }
  0x7f   :  { %1489 = vmatpush.bf16.msrb.mxu1 %v2462_v19  ;;  %1470 = vmatmul.bf16.vlgmr.msrb.gmra.mxu2 %v3989_v35  ;;  %v2509_v19 = vld [vmem:[#allocation5 + $0x128] sm:$0xf]  ;;  %v3658_v58 = vld [vmem:[#allocation5 + $0x614] sm:$0xf0]  ;;  %v2447_v16 = vld [vmem:[#allocation5 + $0xb8] sm:$0xf0] }
  0x80   :  { %1527 = vmatpush.bf16.msra.mxu2 %v2862_v18  ;;  %v3538_v18 = vld [vmem:[#allocation5 + $0x254] sm:$0xf0]  ;;  %v2510_v28 = vor.u32 %v3502_v20, %v2509_v19  ;;  %v3134_v3 = vor.u32 %v3658_v58, %v3133_v56  ;;  %v2941_v20 = vld [vmem:[#allocation5 + $0x488] sm:$0xf]  ;;  %v2415_v42 = vld [vmem:[#allocation5 + $0x78] sm:$0xf0] }
  0x81   :  { %1502 = vmatpush.bf16.msrb.mxu3 %v2590_v24  ;;  %v3566_v24 = vld [vmem:[#allocation5 + $0x334] sm:$0xf0]  ;;  %v2654_v27 = vor.u32 %v3538_v18, %v2653_v17  ;;  %v3520_v17 = vld [vmem:[#allocation5 + $0x1cc] sm:$0xf]  ;;  %v2591_v18 = vld [vmem:[#allocation5 + $0x1d8] sm:$0xf0] }
  0x82   :  { %1515 = vmatpush.bf16.msra.mxu0 %v2718_v37  ;;  %v2766_v37 = vor.u32 %v3566_v24, %v2765_v22  ;;  %v3646_v11 = vld [vmem:[#allocation5 + $0x5b4] sm:$0xf0]  ;;  %v3069_v22 = vld [vmem:[#allocation5 + $0x588] sm:$0xf]  ;;  %v2450_v24 = vor.u32 %v3484_v13, %v2447_v16  ;;  %v2594_v26 = vor.u32 %v3520_v17, %v2591_v18  ;;  %v2399_v58 = vld [vmem:[#allocation5 + $0x58] sm:$0xf0] }
  0x83   :  { %1490 = vmatpush.bf16.msrb.mxu1 %v2446_v32  ;;  %v3534_v32 = vld [vmem:[#allocation5 + $0x234] sm:$0xf0]  ;;  %v2925_v33 = vld [vmem:[#allocation5 + $0x468] sm:$0xf]  ;;  %v2735_v16 = vld [vmem:[#allocation5 + $0x2f8] sm:$0xf0] }
  0x84   :  { %1528 = vmatpush.bf16.msra.mxu2 %v2846_v31  ;;  %v2637_v31 = vld [vmem:[#allocation5 + $0x228] sm:$0xf]  ;;  %v3606_v34 = vld [vmem:[#allocation5 + $0x474] sm:$0xf0]  ;;  %v3588_v18 = vld [vmem:[#allocation5 + $0x3ec] sm:$0xf] }
  0x85   :  { %1503 = vmatpush.bf16.msrb.mxu3 %v2574_v38  ;;  %v3117_v38 = vld [vmem:[#allocation5 + $0x5e8] sm:$0xf]  ;;  %v2638_v43 = vor.u32 %v3534_v32, %v2637_v31  ;;  %v2575_v31 = vld [vmem:[#allocation5 + $0x1b8] sm:$0xf0] }
  0x86   :  { %1516 = vmatpush.bf16.msra.mxu0 %v2702_v50  ;;  %v2621_v50 = vld [vmem:[#allocation5 + $0x208] sm:$0xf]  ;;  %v3118_v53 = vor.u32 %v3654_v39, %v3117_v38  ;;  %v3476_v39 = vld [vmem:[#allocation5 + $0x6c] sm:$0xf]  ;;  %v2578_v40 = vor.u32 %v3516_v29, %v2575_v31  ;;  %v2719_v31 = vld [vmem:[#allocation5 + $0x2d8] sm:$0xf0] }
  0x87   :  { %1491 = vmatpush.bf16.msrb.mxu1 %v2430_v46  ;;  %v2479_v46 = vld [vmem:[#allocation5 + $0xf8] sm:$0xf0]  ;;  %v3053_v36 = vld [vmem:[#allocation5 + $0x568] sm:$0xf] }
  0x88   :  { %1529 = vmatpush.bf16.msra.mxu2 %v2830_v44  ;;  %v3492_v44 = vld [vmem:[#allocation5 + $0xec] sm:$0xf]  ;;  %v3005_v13 = vld [vmem:[#allocation5 + $0x508] sm:$0xf] }
  0x89   :  { %1504 = vmatpush.bf16.msrb.mxu3 %v2558_v52  ;;  %3140 = vmatmul.msk.bf16.vlgmr.msrb.gmra.mxu0 %vm1302_vm0, %v3983_v45  ;;  %v3530_v52 = vld [vmem:[#allocation5 + $0x214] sm:$0xf0]  ;;  %v2482_v62 = vor.u32 %v3492_v44, %v2479_v46  ;;  %v2559_v44 = vld [vmem:[#allocation5 + $0x198] sm:$0xf0] }
  0x8a   :  { %1517 = vmatpush.bf16.msra.mxu0 %v2686_v1  ;;  %v2622_v63 = vor.u32 %v3530_v52, %v2621_v50  ;;  %v2974_v1 = vor.u32 %v3618_v54, %v2973_v49  ;;  %v3037_v49 = vld [vmem:[#allocation5 + $0x548] sm:$0xf]  ;;  %v3634_v50 = vld [vmem:[#allocation5 + $0x554] sm:$0xf0]  ;;  %v2418_v52 = vor.u32 %v3476_v39, %v2415_v42  ;;  %v3616_v39 = vld [vmem:[#allocation5 + $0x4cc] sm:$0xf] }
  0x8b   :  { %1492 = vmatpush.bf16.msrb.mxu1 %v2414_v61  ;;  %v3650_v61 = vld [vmem:[#allocation5 + $0x5d4] sm:$0xf0]  ;;  %v2975_v42 = vld [vmem:[#allocation5 + $0x4d8] sm:$0xf0] }
  0x8c   :  { %1530 = vmatpush.bf16.msra.mxu2 %v2814_v60  ;;  %v3101_v60 = vld [vmem:[#allocation5 + $0x5c8] sm:$0xf] }
  0x8d   :  { %1505 = vmatpush.bf16.msrb.mxu3 %v2542_v2  ;;  %v2463_v2 = vld [vmem:[#allocation5 + $0xd8] sm:$0xf0]  ;;  %v3102_v7 = vor.u32 %v3650_v61, %v3101_v60  ;;  %v3038_v61 = vor.u32 %v3634_v50, %v3037_v49 }
  0x8e   :  { %1518 = vmatpush.bf16.msra.mxu0 %v2670_v14  ;;  %v2466_v12 = vor.u32 %v3488_v0, %v2463_v2  ;;  %v2610_v14 = vor.u32 %v3524_v5, %v2607_v6  ;;  %v2543_v60 = vld [vmem:[#allocation5 + $0x178] sm:$0xf0]  ;;  %v3021_v0 = vld [vmem:[#allocation5 + $0x528] sm:$0xf] }
  0x8f   :  { %1493 = vmatpush.bf16.msrb.mxu1 %v2398_v10  ;;  %v3085_v10 = vld [vmem:[#allocation5 + $0x5a8] sm:$0xf]  ;;  %v2495_v49 = vld [vmem:[#allocation5 + $0x118] sm:$0xf0] }
  0x90   :  { %1531 = vmatpush.bf16.msra.mxu2 %v2798_v9  ;;  %v3614_v9 = vld [vmem:[#allocation5 + $0x4b4] sm:$0xf0]  ;;  %v3086_v19 = vor.u32 %v3646_v11, %v3085_v10  ;;  %v2877_v11 = vld [vmem:[#allocation5 + $0x408] sm:$0xf]  ;;  %v2831_v50 = vld [vmem:[#allocation5 + $0x3b8] sm:$0xf0] }
  0x91   :  { %1506 = vmatpush.bf16.msrb.mxu3 %v2526_v15  ;;  %v2958_v15 = vor.u32 %v3614_v9, %v2957_v8  ;;  %v3504_v8 = vld [vmem:[#allocation5 + $0x14c] sm:$0xf]  ;;  %v2527_v9 = vld [vmem:[#allocation5 + $0x158] sm:$0xf0] }
  0x92   :  { %1519 = vmatpush.bf16.msra.mxu0 %v2654_v27 }
  0x93   :  { %1494 = vmatpush.bf16.msrb.mxu1 %v2382_v23  ;;  %v3642_v23 = vld [vmem:[#allocation5 + $0x594] sm:$0xf0] }
  0x94   :  { %1532 = vmatpush.bf16.msra.mxu2 %v2782_v21  ;;  %v3610_v21 = vld [vmem:[#allocation5 + $0x494] sm:$0xf0]  ;;  %v3070_v32 = vor.u32 %v3642_v23, %v3069_v22  ;;  %v3464_v22 = vld [vmem:[#allocation5 + $0xc] sm:$0xf]  ;;  %v2367_v23 = vld [vmem:[#allocation5 + $0x18] sm:$0xf0] }
  0x95   :  { %1507 = vmatpush.bf16.msrb.mxu3 %v2510_v28  ;;  %v2942_v27 = vor.u32 %v3610_v21, %v2941_v20  ;;  %v2431_v28 = vld [vmem:[#allocation5 + $0x98] sm:$0xf0]  ;;  %v2530_v20 = vor.u32 %v3504_v8, %v2527_v9  ;;  %v3608_v8 = vld [vmem:[#allocation5 + $0x48c] sm:$0xf] }
  0x96   :  { %1520 = vmatpush.bf16.msra.mxu0 %v2638_v43  ;;  %v2434_v38 = vor.u32 %v3480_v25, %v2431_v28  ;;  %v3512_v43 = vld [vmem:[#allocation5 + $0x18c] sm:$0xf]  ;;  %v2943_v9 = vld [vmem:[#allocation5 + $0x498] sm:$0xf0] }
  0x97   :  { %1495 = vmatpush.bf16.msrb.mxu1 %v2366_v41  ;;  %v2926_v41 = vor.u32 %v3606_v34, %v2925_v33  ;;  %v2562_v54 = vor.u32 %v3512_v43, %v2559_v44  ;;  %v3552_v28 = vld [vmem:[#allocation5 + $0x2cc] sm:$0xf]  ;;  %v2511_v33 = vld [vmem:[#allocation5 + $0x138] sm:$0xf0]  ;;  %v2370_v34 = vor.u32 %v3464_v22, %v2367_v23 }
  0x98   :  { %1533 = vmatpush.bf16.msra.mxu2 %v2766_v37  ;;  %v3638_v37 = vld [vmem:[#allocation5 + $0x574] sm:$0xf0]  ;;  %v3548_v43 = vld [vmem:[#allocation5 + $0x2ac] sm:$0xf]  ;;  %v2703_v44 = vld [vmem:[#allocation5 + $0x2b8] sm:$0xf0] }
  0x99   :  { %1508 = vmatpush.bf16.msrb.mxu3 %v2494_v47  ;;  %v3054_v46 = vor.u32 %v3638_v37, %v3053_v36  ;;  %v2909_v47 = vld [vmem:[#allocation5 + $0x448] sm:$0xf]  ;;  %v3584_v36 = vld [vmem:[#allocation5 + $0x3cc] sm:$0xf]  ;;  %v2847_v37 = vld [vmem:[#allocation5 + $0x3d8] sm:$0xf0] }
  0x9a   :  { %1496 = vmatmul.bf16.vlgmr.msrb.gmra.mxu1 %v3973_v55  ;;  %1521 = vmatpush.bf16.msra.mxu0 %v2622_v63  ;;  %v3598_v63 = vld [vmem:[#allocation5 + $0x434] sm:$0xf0] }
  0x9b   :  { %1540 = vmatpush.bf16.msra.mxu1 %v2990_v48  ;;  %v3602_v48 = vld [vmem:[#allocation5 + $0x454] sm:$0xf0] }
  0x9c   :  { %1534 = vmatpush.bf16.msra.mxu2 %v2750_v59  ;;  %1509 = vmatmul.bf16.vlgmr.msrb.gmra.mxu3 %v3979_v4  ;;  %v2910_v56 = vor.u32 %v3602_v48, %v2909_v47  ;;  %v3508_v59 = vld [vmem:[#allocation5 + $0x16c] sm:$0xf] }
  0x9d   :  { %1553 = vmatpush.bf16.msra.mxu3 %v3118_v53  ;;  %1522 = vmatmul.bf16.vlgmr.msra.gmra.mxu0 %v3971_v51  ;;  %v3472_v53 = vld [vmem:[#allocation5 + $0x4c] sm:$0xf]  ;;  %v2546_v5 = vor.u32 %v3508_v59, %v2543_v60  ;;  %v2959_v60 = vld [vmem:[#allocation5 + $0x4b8] sm:$0xf0] }
  0x9e   :  { %1573 = vmatpush.bf16.msrb.mxu0 %v3134_v3  ;;  %v2402_v2 = vor.u32 %v3472_v53, %v2399_v58  ;;  %v3468_v3 = vld [vmem:[#allocation5 + $0x2c] sm:$0xf]  ;;  %v3119_v53 = vld [vmem:[#allocation5 + $0x5f8] sm:$0xf0] }
  0x9f   :  { %1541 = vmatpush.bf16.msra.mxu1 %v2974_v1  ;;  %1535 = vmatmul.bf16.vlgmr.msra.gmra.mxu2 %v3975_v57  ;;  %v3630_v1 = vld [vmem:[#allocation5 + $0x534] sm:$0xf0]  ;;  %v3580_v47 = vld [vmem:[#allocation5 + $0x3ac] sm:$0xf] }
  0xa0   :  { %1579 = vmatpush.bf16.msrb.mxu2 %v2482_v62  ;;  %v2893_v62 = vld [vmem:[#allocation5 + $0x428] sm:$0xf]  ;;  %v3022_v10 = vor.u32 %v3630_v1, %v3021_v0  ;;  %v3496_v48 = vld [vmem:[#allocation5 + $0x10c] sm:$0xf]  ;;  %v2687_v0 = vld [vmem:[#allocation5 + $0x298] sm:$0xf0] }
  0xa1   :  { %1554 = vmatpush.bf16.msra.mxu3 %v3102_v7  ;;  %v2894_v6 = vor.u32 %v3598_v63, %v2893_v62  ;;  %v2383_v7 = vld [vmem:[#allocation5 + $0x38] sm:$0xf0]  ;;  %v2498_v58 = vor.u32 %v3496_v48, %v2495_v49  ;;  %v3612_v59 = vld [vmem:[#allocation5 + $0x4ac] sm:$0xf]  ;;  %v4019_v49 = vld [vmem:[#allocation7] sm:$0xf] }
  0xa2   :  { %1592 = vmatpush.bf16.msra.mxu0 %v2610_v14  ;;  %v3626_v14 = vld [vmem:[#allocation5 + $0x514] sm:$0xf0]  ;;  %v2386_v17 = vor.u32 %v3468_v3, %v2383_v7  ;;  %v3544_v63 = vld [vmem:[#allocation5 + $0x28c] sm:$0xf] }
  0xa3   :  { %1542 = vmatpush.bf16.msra.mxu1 %v2958_v15  ;;  %v3556_v15 = vld [vmem:[#allocation5 + $0x2ec] sm:$0xf]  ;;  %v2690_v7 = vor.u32 %v3544_v63, %v2687_v0  ;;  %v3039_v0 = vld [vmem:[#allocation5 + $0x558] sm:$0xf0] }
  0xa4   :  { %1580 = vmatpush.bf16.msrb.mxu2 %v2466_v12  ;;  %v3594_v12 = vld [vmem:[#allocation5 + $0x414] sm:$0xf0]  ;;  %v2738_v25 = vor.u32 %v3556_v15, %v2735_v16  ;;  %v3576_v1 = vld [vmem:[#allocation5 + $0x38c] sm:$0xf]  ;;  %v2799_v15 = vld [vmem:[#allocation5 + $0x378] sm:$0xf0] }
  0xa5   :  { %1555 = vmatpush.bf16.msra.mxu3 %v3086_v19  ;;  %v2863_v19 = vld [vmem:[#allocation5 + $0x3f8] sm:$0xf0]  ;;  %v2878_v21 = vor.u32 %v3594_v12, %v2877_v11  ;;  %v3648_v3 = vld [vmem:[#allocation5 + $0x5cc] sm:$0xf] }
  0xa6   :  { %1593 = vmatpush.bf16.msra.mxu0 %v2594_v26  ;;  %v3620_v26 = vld [vmem:[#allocation5 + $0x4ec] sm:$0xf]  ;;  %v2866_v29 = vor.u32 %v3588_v18, %v2863_v19  ;;  %v2946_v18 = vor.u32 %v3608_v8, %v2943_v9 }
  0xa7   :  { %1543 = vmatpush.bf16.msra.mxu1 %v2942_v27  ;;  %v2991_v27 = vld [vmem:[#allocation5 + $0x4f8] sm:$0xf0]  ;;  %v3540_v12 = vld [vmem:[#allocation5 + $0x26c] sm:$0xf] }
  0xa8   :  { %1581 = vmatpush.bf16.msrb.mxu2 %v2450_v24  ;;  %v3006_v24 = vor.u32 %v3626_v14, %v3005_v13  ;;  %v3572_v13 = vld [vmem:[#allocation5 + $0x36c] sm:$0xf] }
  0xa9   :  { %1556 = vmatpush.bf16.msra.mxu3 %v3070_v32  ;;  %v3500_v32 = vld [vmem:[#allocation5 + $0x12c] sm:$0xf]  ;;  %v2802_v22 = vor.u32 %v3572_v13, %v2799_v15  ;;  %v3135_v15 = vld [vmem:[#allocation5 + $0x618] sm:$0xf0] }
  0xaa   :  { %1594 = vmatpush.bf16.msra.mxu0 %v2578_v40  ;;  %v2722_v40 = vor.u32 %v3552_v28, %v2719_v31  ;;  %v3644_v16 = vld [vmem:[#allocation5 + $0x5ac] sm:$0xf]  ;;  %v2783_v28 = vld [vmem:[#allocation5 + $0x358] sm:$0xf0] }
  0xab   :  { %1544 = vmatpush.bf16.msra.mxu1 %v2926_v41  ;;  %v2514_v41 = vor.u32 %v3500_v32, %v2511_v33  ;;  %v3071_v31 = vld [vmem:[#allocation5 + $0x598] sm:$0xf0]  ;;  %v3632_v63 = vld [vmem:[#allocation5 + $0x54c] sm:$0xf] }
  0xac   :  { %1582 = vmatpush.bf16.msrb.mxu2 %v2434_v38  ;;  %v2994_v38 = vor.u32 %v3620_v26, %v2991_v27  ;;  %v3568_v26 = vld [vmem:[#allocation5 + $0x34c] sm:$0xf] }
  0xad   :  { %1557 = vmatpush.bf16.msra.mxu3 %v3054_v46  ;;  %3141 = vmatmul.msk.bf16.vlgmr.msrb.gmra.mxu0 %vm1302_vm0, %v3983_v45  ;;  %v2850_v46 = vor.u32 %v3584_v36, %v2847_v37  ;;  %v2911_v36 = vld [vmem:[#allocation5 + $0x458] sm:$0xf0]  ;;  %v3592_v9 = vld [vmem:[#allocation5 + $0x40c] sm:$0xf] }
  0xae   :  { %1595 = vmatpush.bf16.msra.mxu0 %v2562_v54  ;;  %v2978_v54 = vor.u32 %v3616_v39, %v2975_v42  ;;  %v3564_v42 = vld [vmem:[#allocation5 + $0x32c] sm:$0xf] }
  0xaf   :  { %1545 = vmatpush.bf16.msra.mxu1 %v2910_v56  ;;  %v2706_v56 = vor.u32 %v3548_v43, %v2703_v44  ;;  %v2767_v43 = vld [vmem:[#allocation5 + $0x338] sm:$0xf0]  ;;  %v3636_v44 = vld [vmem:[#allocation5 + $0x56c] sm:$0xf] }
  0xb0   :  { %1583 = vmatpush.bf16.msrb.mxu2 %v2418_v52  ;;  %v3652_v52 = vld [vmem:[#allocation5 + $0x5ec] sm:$0xf] }
  0xb1   :  { %1558 = vmatpush.bf16.msra.mxu3 %v3038_v61  ;;  %v2834_v61 = vor.u32 %v3580_v47, %v2831_v50  ;;  %v3122_v62 = vor.u32 %v3652_v52, %v3119_v53  ;;  %v3596_v52 = vld [vmem:[#allocation5 + $0x42c] sm:$0xf]  ;;  %v2895_v53 = vld [vmem:[#allocation5 + $0x438] sm:$0xf0] }
  0xb2   :  { %1596 = vmatpush.bf16.msra.mxu0 %v2546_v5  ;;  %v3103_v5 = vld [vmem:[#allocation5 + $0x5d8] sm:$0xf0]  ;;  %v3656_v13 = vld [vmem:[#allocation5 + $0x60c] sm:$0xf] }
  0xb3   :  { %1546 = vmatpush.bf16.msra.mxu1 %v2894_v6  ;;  %v2962_v6 = vor.u32 %v3612_v59, %v2959_v60  ;;  %v3106_v11 = vor.u32 %v3648_v3, %v3103_v5  ;;  %v2623_v59 = vld [vmem:[#allocation5 + $0x218] sm:$0xf0]  ;;  %v3560_v60 = vld [vmem:[#allocation5 + $0x30c] sm:$0xf]  ;;  %v3265_v5 = vld [vmem:[#allocation8 + $0xf0] sm:$0xf] }
  0xb4   :  { %1584 = vmatpush.bf16.msrb.mxu2 %v2402_v2  ;;  %v2815_v2 = vld [vmem:[#allocation5 + $0x398] sm:$0xf0] }
  0xb5   :  { %1559 = vmatpush.bf16.msra.mxu3 %v3022_v10  ;;  %v2818_v10 = vor.u32 %v3576_v1, %v2815_v2  ;;  %v2898_v2 = vor.u32 %v3596_v52, %v2895_v53  ;;  %v3674_v3 = vld [vmem:[#allocation8 + $0x74] sm:$0xf0]  ;;  %v3169_v53 = vld [vmem:[#allocation8 + $0x30] sm:$0xf] }
  0xb6   :  { %1597 = vmatpush.bf16.msra.mxu0 %v2530_v20  ;;  %v4010_v14 = vpop.f32.mrf.mxu0  ;;  %v3604_v20 = vld [vmem:[#allocation5 + $0x46c] sm:$0xf] }
  0xb7   :  { %1547 = vmatpush.bf16.msra.mxu1 %v2878_v21  ;;  %v2927_v21 = vld [vmem:[#allocation5 + $0x478] sm:$0xf0] }
  0xb8   :  { %1585 = vmatpush.bf16.msrb.mxu2 %v2386_v17  ;;  %v3087_v17 = vld [vmem:[#allocation5 + $0x5b8] sm:$0xf0]  ;;  %v2930_v32 = vor.u32 %v3604_v20, %v2927_v21 }
  0xb9   :  { %1560 = vmatpush.bf16.msra.mxu3 %v3006_v24  ;;  %v3090_v23 = vor.u32 %v3644_v16, %v3087_v17  ;;  %v3536_v24 = vld [vmem:[#allocation5 + $0x24c] sm:$0xf] }
  0xba   :  { %1548 = vmatmul.bf16.vlgmr.msra.gmra.mxu1 %v3987_v30  ;;  %1598 = vmatpush.bf16.msra.mxu0 %v2514_v41  ;;  %v2639_v41 = vld [vmem:[#allocation5 + $0x238] sm:$0xf0] }
  0xbb   :  { %1605 = vmatpush.bf16.msrb.mxu1 %v2738_v25  ;;  %v2655_v25 = vld [vmem:[#allocation5 + $0x258] sm:$0xf0] }
  0xbc   :  { %1586 = vmatpush.bf16.msrb.mxu2 %v2370_v34  ;;  %1561 = vmatmul.bf16.vlgmr.msra.gmra.mxu3 %v3989_v35  ;;  %v2658_v33 = vor.u32 %v3536_v24, %v2655_v25  ;;  %v3600_v34 = vld [vmem:[#allocation5 + $0x44c] sm:$0xf]  ;;  %v3138_v24 = vor.u32 %v3656_v13, %v3135_v15  ;;  %v3257_v25 = vld [vmem:[#allocation8 + $0xe0] sm:$0xf] }
  0xbd   :  { %1618 = vmatpush.bf16.msrb.mxu3 %v2866_v29  ;;  %v4013_v27 = vpop.f32.mrf.mxu1  ;;  %v3640_v29 = vld [vmem:[#allocation5 + $0x58c] sm:$0xf]  ;;  %v2914_v48 = vor.u32 %v3600_v34, %v2911_v36  ;;  %v3185_v34 = vld [vmem:[#allocation8 + $0x50] sm:$0xf]  ;;  %v3670_v36 = vld [vmem:[#allocation8 + $0x54] sm:$0xf0] }
  0xbe   :  { %1599 = vmatpush.bf16.msra.mxu0 %v2498_v58  ;;  %v3074_v39 = vor.u32 %v3640_v29, %v3071_v31  ;;  %v1317_v47 = vpop.f32.mrf.mxu0  ;;  %v3145_v15 = vld [vmem:[#allocation8] sm:$0xf] }
  0xbf   :  { %1606 = vmatpush.bf16.msrb.mxu1 %v2722_v40  ;;  %1587 = vmatmul.bf16.vlgmr.msrb.gmra.mxu2 %v3973_v55  ;;  %v2671_v55 = vld [vmem:[#allocation5 + $0x278] sm:$0xf0]  ;;  %v3532_v40 = vld [vmem:[#allocation5 + $0x22c] sm:$0xf]  ;;  %v3241_v47 = vld [vmem:[#allocation8 + $0xc0] sm:$0xf] }
  0xc0   :  { %1631 = vmatpush.bf16.msra.mxu2 %v2994_v38  ;;  %v2674_v19 = vor.u32 %v3540_v12, %v2671_v55  ;;  %v2786_v38 = vor.u32 %v3568_v26, %v2783_v28  ;;  %v2642_v50 = vor.u32 %v3532_v40, %v2639_v41  ;;  %v3042_v55 = vor.u32 %v3632_v63, %v3039_v0  ;;  %v3688_v26 = vld [vmem:[#allocation8 + $0xe4] sm:$0xf0]  ;;  %v3249_v40 = vld [vmem:[#allocation8 + $0xd0] sm:$0xf] }
  0xc1   :  { %1619 = vmatpush.bf16.msrb.mxu3 %v2850_v46  ;;  %1600 = vmatmul.bf16.vlgmr.msra.gmra.mxu0 %v3979_v4  ;;  %v4015_v4 = vpop.f32.mrf.mxu2  ;;  %v4017_v37 = vpop.f32.mrf.mxu3  ;;  %v3055_v46 = vld [vmem:[#allocation5 + $0x578] sm:$0xf0]  ;;  %v3664_v63 = vld [vmem:[#allocation8 + $0x24] sm:$0xf0] }
  0xc2   :  { %1644 = vmatpush.bf16.msrb.mxu0 %v3122_v62  ;;  %v3058_v58 = vor.u32 %v3636_v44, %v3055_v46  ;;  %v3201_v62 = vld [vmem:[#allocation8 + $0x70] sm:$0xf]  ;;  %v3177_v44 = vld [vmem:[#allocation8 + $0x40] sm:$0xf] }
  0xc3   :  { %1607 = vmatpush.bf16.msrb.mxu1 %v2706_v56  ;;  %v2770_v56 = vor.u32 %v3564_v42, %v2767_v43  ;;  %v3202_v17 = vor.u32 %v3674_v3, %v3201_v62  ;;  %v3186_v43 = vor.u32 %v3670_v36, %v3185_v34  ;;  %v3687_v34 = vld [vmem:[#allocation8 + $0xe4] sm:$0xf]  ;;  %v3259_v36 = vld [vmem:[#allocation8 + $0xe8] sm:$0xf0] }
  0xc4   :  { %1632 = vmatpush.bf16.msra.mxu2 %v2978_v54  ;;  %v3528_v54 = vld [vmem:[#allocation5 + $0x20c] sm:$0xf] }
  0xc5   :  { %1620 = vmatpush.bf16.msrb.mxu3 %v2834_v61  ;;  %v2751_v61 = vld [vmem:[#allocation5 + $0x318] sm:$0xf0]  ;;  %v1330_v1 = vpop.f32.mrf.mxu1  ;;  %v2626_v8 = vor.u32 %v3528_v54, %v2623_v59 }
  0xc6   :  { %1645 = vmatpush.bf16.msrb.mxu0 %v3106_v11  ;;  %v314_v11 = vperm.slane %v4019_v49, 0  ;;  %v2754_v12 = vor.u32 %v3560_v60, %v2751_v61  ;;  %v3682_v59 = vld [vmem:[#allocation8 + $0xb4] sm:$0xf0]  ;;  %v3225_v1 = vld [vmem:[#allocation8 + $0xa0] sm:$0xf] }
  0xc7   :  { %1608 = vmatpush.bf16.msrb.mxu1 %v2690_v7 }
  0xc8   :  { %1633 = vmatpush.bf16.msra.mxu2 %v2962_v6  ;;  %v3690_v6 = vld [vmem:[#allocation8 + $0xf4] sm:$0xf0]  ;;  %v1316_v28 = vadd.f32 %v4010_v14, %v314_v11 }
  0xc9   :  { %1621 = vmatpush.bf16.msrb.mxu3 %v2818_v10  ;;  %v1343_v7 = vpop.f32.mrf.mxu2  ;;  %v2879_v10 = vld [vmem:[#allocation5 + $0x418] sm:$0xf0]  ;;  %v1356_v16 = vpop.f32.mrf.mxu3  ;;  %v3266_v20 = vor.u32 %v3690_v6, %v3265_v5  ;;  %v3153_v6 = vld [vmem:[#allocation8 + $0x10] sm:$0xf] }
  0xca   :  { %1646 = vmatpush.bf16.msrb.mxu0 %v3090_v23  ;;  %v2882_v21 = vor.u32 %v3592_v9, %v2879_v10  ;;  %v3672_v23 = vld [vmem:[#allocation8 + $0x64] sm:$0xf0]  ;;  %v3686_v14 = vld [vmem:[#allocation8 + $0xd4] sm:$0xf0]  ;;  %v1329_v41 = vadd.f32 %v4013_v27, %v1316_v28 }
  0xcb   :  { %1609 = vmatpush.bf16.msrb.mxu1 %v2674_v19  ;;  %v3023_v19 = vld [vmem:[#allocation5 + $0x538] sm:$0xf0]  ;;  %v3250_v46 = vor.u32 %v3686_v14, %v3249_v40  ;;  %v3660_v16 = vld [vmem:[#allocation8 + $0x4] sm:$0xf0]  ;;  %v3669_v14 = vld [vmem:[#allocation8 + $0x54] sm:$0xf] }
  0xcc   :  { %1634 = vmatpush.bf16.msra.mxu2 %v2946_v18  ;;  %v3628_v18 = vld [vmem:[#allocation5 + $0x52c] sm:$0xf]  ;;  %v3666_v27 = vld [vmem:[#allocation8 + $0x34] sm:$0xf0] }
  0xcd   :  { %1622 = vmatpush.bf16.msrb.mxu3 %v2802_v22  ;;  %v3193_v22 = vld [vmem:[#allocation8 + $0x60] sm:$0xf]  ;;  %v3026_v29 = vor.u32 %v3628_v18, %v3023_v19  ;;  %v3170_v61 = vor.u32 %v3666_v27, %v3169_v53  ;;  %v3662_v7 = vld [vmem:[#allocation8 + $0x14] sm:$0xf0]  ;;  %v3203_v19 = vld [vmem:[#allocation8 + $0x78] sm:$0xf0] }
  0xce   :  { %1647 = vmatpush.bf16.msrb.mxu0 %v3074_v39  ;;  %v3194_v31 = vor.u32 %v3672_v23, %v3193_v22  ;;  %v3678_v11 = vld [vmem:[#allocation8 + $0x94] sm:$0xf0]  ;;  %v3689_v22 = vld [vmem:[#allocation8 + $0xf4] sm:$0xf]  ;;  %v3267_v23 = vld [vmem:[#allocation8 + $0xf8] sm:$0xf0] }
  0xcf   :  { %1610 = vmatpush.bf16.msrb.mxu1 %v2658_v33  ;;  %v3007_v33 = vld [vmem:[#allocation5 + $0x518] sm:$0xf0]  ;;  %v3667_v53 = vld [vmem:[#allocation8 + $0x44] sm:$0xf]  ;;  %v3179_v27 = vld [vmem:[#allocation8 + $0x48] sm:$0xf0] }
  0xd0   :  { %1635 = vmatpush.bf16.msra.mxu2 %v2930_v32  ;;  %v3624_v32 = vld [vmem:[#allocation5 + $0x50c] sm:$0xf] }
  0xd1   :  { %1623 = vmatpush.bf16.msrb.mxu3 %v2786_v38  ;;  %v3258_v38 = vor.u32 %v3688_v26, %v3257_v25  ;;  %v1393_v39 = vpop.f32.mrf.mxu2  ;;  %v3010_v42 = vor.u32 %v3624_v32, %v3007_v33  ;;  %v3270_v32 = vor.u32 %v3689_v22, %v3267_v23  ;;  %v3219_v22 = vld [vmem:[#allocation8 + $0x98] sm:$0xf0] }
  0xd2   :  { %1648 = vmatpush.bf16.msrb.mxu0 %v3058_v58  ;;  %v3233_v58 = vld [vmem:[#allocation8 + $0xb0] sm:$0xf] }
  0xd3   :  { %1611 = vmatpush.bf16.msrb.mxu1 %v2642_v50  ;;  %v3234_v0 = vor.u32 %v3682_v59, %v3233_v58  ;;  %v3243_v58 = vld [vmem:[#allocation8 + $0xc8] sm:$0xf0]  ;;  %v3313_v59 = vld [vmem:[#allocation8 + $0x150] sm:$0xf] }
  0xd4   :  { %1636 = vmatpush.bf16.msra.mxu2 %v2914_v48  ;;  %v3684_v48 = vld [vmem:[#allocation8 + $0xc4] sm:$0xf0] }
  0xd5   :  { %1624 = vmatpush.bf16.msrb.mxu3 %v2770_v56  ;;  %v3242_v54 = vor.u32 %v3684_v48, %v3241_v47 }
  0xd6   :  { %1649 = vmatpush.bf16.msrb.mxu0 %v3042_v55  ;;  %v1367_v52 = vpop.f32.mrf.mxu0  ;;  %v3154_v55 = vor.u32 %v3662_v7, %v3153_v6 }
  0xd7   :  { %1612 = vmatpush.bf16.msrb.mxu1 %v2626_v8  ;;  %v1380_v56 = vpop.f32.mrf.mxu1 }
  0xd8   :  { %1637 = vmatpush.bf16.msra.mxu2 %v2898_v2  ;;  %v3680_v2 = vld [vmem:[#allocation8 + $0xa4] sm:$0xf0] }
  0xd9   :  { %1625 = vmatpush.bf16.msrb.mxu3 %v2754_v12  ;;  %v3226_v9 = vor.u32 %v3680_v2, %v3225_v1 }
  0xda   :  { %1613 = vmatmul.bf16.vlgmr.msrb.gmra.mxu1 %v3971_v51  ;;  %1650 = vmatpush.bf16.msrb.mxu0 %v3026_v29  ;;  %v3668_v51 = vld [vmem:[#allocation8 + $0x44] sm:$0xf0] }
  0xdb   :  { %2081 = vmatpush.bf16.msra.mxu1 %v3266_v20  ;;  %v3178_v50 = vor.u32 %v3668_v51, %v3177_v44  ;;  %v3209_v20 = vld [vmem:[#allocation8 + $0x80] sm:$0xf]  ;;  %v3685_v44 = vld [vmem:[#allocation8 + $0xd4] sm:$0xf]  ;;  %v3251_v51 = vld [vmem:[#allocation8 + $0xd8] sm:$0xf0] }
  0xdc   :  { %1638 = vmatpush.bf16.msra.mxu2 %v2882_v21  ;;  %1626 = vmatmul.bf16.vlgmr.msrb.gmra.mxu3 %v3975_v57  ;;  %v1342_v57 = vadd.f32 %v4015_v4, %v1329_v41  ;;  %v3161_v4 = vld [vmem:[#allocation8 + $0x20] sm:$0xf]  ;;  %v3676_v21 = vld [vmem:[#allocation8 + $0x84] sm:$0xf0]  ;;  %v3187_v41 = vld [vmem:[#allocation8 + $0x58] sm:$0xf0] }
  0xdd   :  { %2068 = vmatpush.bf16.msra.mxu3 %v3202_v17  ;;  %v3162_v3 = vor.u32 %v3664_v63, %v3161_v4  ;;  %v3673_v17 = vld [vmem:[#allocation8 + $0x74] sm:$0xf]  ;;  %v3210_v29 = vor.u32 %v3676_v21, %v3209_v20  ;;  %v3171_v63 = vld [vmem:[#allocation8 + $0x38] sm:$0xf0]  ;;  %v3700_v20 = vld [vmem:[#allocation8 + $0x144] sm:$0xf0] }
  0xde   :  { %1651 = vmatpush.bf16.msrb.mxu0 %v3010_v42  ;;  %v1355_v60 = vadd.f32 %v4017_v37, %v1342_v57  ;;  %v3217_v37 = vld [vmem:[#allocation8 + $0x90] sm:$0xf]  ;;  %v3206_v26 = vor.u32 %v3673_v17, %v3203_v19  ;;  %v3262_v42 = vor.u32 %v3687_v34, %v3259_v36  ;;  %v3321_v57 = vld [vmem:[#allocation8 + $0x160] sm:$0xf]  ;;  %v3665_v4 = vld [vmem:[#allocation8 + $0x34] sm:$0xf] }
  0xdf   :  { %1639 = vmatmul.bf16.vlgmr.msra.gmra.mxu2 %v3987_v30  ;;  %2082 = vmatpush.bf16.msra.mxu1 %v3258_v38  ;;  %v1395_v30 = vpop.f32.mrf.mxu2  ;;  %v1406_v8 = vpop.f32.mrf.mxu3  ;;  %v3218_v18 = vor.u32 %v3678_v11, %v3217_v37  ;;  %v315_v38 = vperm.slane %v4019_v49, 1  ;;  %v3174_v7 = vor.u32 %v3665_v4, %v3171_v63  ;;  %v3679_v37 = vld [vmem:[#allocation8 + $0xa4] sm:$0xf]  ;;  %v3227_v11 = vld [vmem:[#allocation8 + $0xa8] sm:$0xf0] }
  0xe0   :  { %1664 = vmatpush.bf16.msrb.mxu2 %v3138_v24  ;;  %v1368_v62 = vadd.f32 %v1367_v52, %v1355_v60  ;;  %v1382_v10 = vpop.f32.mrf.mxu1  ;;  %v3146_v24 = vor.u32 %v3660_v16, %v3145_v15  ;;  %v3190_v52 = vor.u32 %v3669_v14, %v3187_v41  ;;  %v3702_v60 = vld [vmem:[#allocation8 + $0x154] sm:$0xf0]  ;;  %v3155_v15 = vld [vmem:[#allocation8 + $0x18] sm:$0xf0]  ;;  %v3230_v17 = vor.u32 %v3679_v37, %v3227_v11  ;;  %v3305_v19 = vld [vmem:[#allocation8 + $0x140] sm:$0xf] }
  0xe1   :  { %2069 = vmatpush.bf16.msra.mxu3 %v3194_v31  ;;  %1652 = vmatmul.bf16.vlgmr.msrb.gmra.mxu0 %v3989_v35  ;;  %v1369_v35 = vpop.f32.mrf.mxu0  ;;  %v3195_v31 = vld [vmem:[#allocation8 + $0x68] sm:$0xf0]  ;;  %v1407_v47 = vadd.f32 %v1406_v8, %v315_v38  ;;  %v3314_v1 = vor.u32 %v3702_v60, %v3313_v59  ;;  %v3306_v23 = vor.u32 %v3700_v20, %v3305_v19  ;;  %v3289_v34 = vld [vmem:[#allocation8 + $0x120] sm:$0xf]  ;;  %v3696_v36 = vld [vmem:[#allocation8 + $0x124] sm:$0xf0] }
  0xe2   :  { %v1381_v5 = vadd.f32 %v1380_v56, %v1368_v62  ;;  %v3683_v56 = vld [vmem:[#allocation8 + $0xc4] sm:$0xf]  ;;  %v3182_v62 = vor.u32 %v3667_v53, %v3179_v27  ;;  %v3163_v8 = vld [vmem:[#allocation8 + $0x28] sm:$0xf0]  ;;  %v3273_v27 = vld [vmem:[#allocation8 + $0x100] sm:$0xf] }
  0xe3   :  { %2083 = vmatpush.bf16.msra.mxu1 %v3250_v46  ;;  %v3706_v46 = vld [vmem:[#allocation8 + $0x174] sm:$0xf0]  ;;  %v3663_v35 = vld [vmem:[#allocation8 + $0x24] sm:$0xf]  ;;  %v3211_v14 = vld [vmem:[#allocation8 + $0x88] sm:$0xf0] }
  0xe4   :  { %v1394_v13 = vadd.f32 %v1393_v39, %v1381_v5  ;;  %v3235_v5 = vld [vmem:[#allocation8 + $0xb8] sm:$0xf0]  ;;  %v3705_v59 = vld [vmem:[#allocation8 + $0x174] sm:$0xf]  ;;  %v3323_v4 = vld [vmem:[#allocation8 + $0x168] sm:$0xf0] }
  0xe5   :  { %2070 = vmatpush.bf16.msra.mxu3 %v3186_v43  ;;  %v3329_v43 = vld [vmem:[#allocation8 + $0x170] sm:$0xf]  ;;  %v3331_v60 = vld [vmem:[#allocation8 + $0x178] sm:$0xf0]  ;;  %v3720_v20 = vld [vmem:[#allocation8 + $0x1e4] sm:$0xf0] }
  0xe6   :  { %v1670_v25 = vmax.f32 %v1394_v13, 0.0  ;;  %v3330_v48 = vor.u32 %v3706_v46, %v3329_v43  ;;  %v3661_v13 = vld [vmem:[#allocation8 + $0x14] sm:$0xf]  ;;  %v3290_v43 = vor.u32 %v3696_v36, %v3289_v34  ;;  %v3281_v46 = vld [vmem:[#allocation8 + $0x110] sm:$0xf] }
  0xe7   :  { %2084 = vmatpush.bf16.msra.mxu1 %v3242_v54  ;;  %v1419_v12 = vpop.f32.mrf.mxu2  ;;  %v1408_v28 = vpop.f32.mrf.mxu3  ;;  %v3254_v54 = vor.u32 %v3685_v44, %v3251_v51  ;;  %v3299_v37 = vld [vmem:[#allocation8 + $0x138] sm:$0xf0] }
  0xe8   :  { %v4033_v39 = vpack.c.bf16 %v1670_v25, %v1670_v25  ;;  %2094 = vmatpush.bf16.msra.mxu2 %v3330_v48  ;;  %v3698_v25 = vld [vmem:[#allocation8 + $0x134] sm:$0xf0] }
  0xe9   :  { %2071 = vmatpush.bf16.msra.mxu3 %v3178_v50  ;;  %v3704_v50 = vld [vmem:[#allocation8 + $0x164] sm:$0xf0] }
  0xea   :  { %v3322_v30 = vor.u32 %v3704_v50, %v3321_v57 }
  0xeb   :  { %2085 = vmatpush.bf16.msra.mxu1 %v3234_v0  ;;  %v3246_v0 = vor.u32 %v3683_v56, %v3243_v58 }
  0xec   :  { %2095 = vmatpush.bf16.msra.mxu2 %v3322_v30 }
  0xed   :  { %2072 = vmatpush.bf16.msra.mxu3 %v3170_v61  ;;  %v1420_v61 = vadd.f32 %v1419_v12, %v1407_v47  ;;  %v3694_v47 = vld [vmem:[#allocation8 + $0x114] sm:$0xf0] }
  0xef   :  { %3142 = vmatmul.msk.bf16.vlgmr.msrb.gmra.mxu2 %vm1302_vm0, %v3983_v45  ;;  %2086 = vmatpush.bf16.msra.mxu1 %v3226_v9  ;;  %v3671_v45 = vld [vmem:[#allocation8 + $0x64] sm:$0xf]  ;;  %v1421_v33 = vpop.f32.mrf.mxu2 }
  0xf0   :  { %v3198_v40 = vor.u32 %v3671_v45, %v3195_v31  ;;  %2096 = vmatpush.bf16.msra.mxu2 %v3314_v1  ;;  %v3659_v45 = vld [vmem:[#allocation8 + $0x4] sm:$0xf]  ;;  %v3701_v1 = vld [vmem:[#allocation8 + $0x154] sm:$0xf] }
  0xf1   :  { %2073 = vmatpush.bf16.msra.mxu3 %v3162_v3  ;;  %v3681_v3 = vld [vmem:[#allocation8 + $0xb4] sm:$0xf] }
  0xf2   :  { %v3238_v9 = vor.u32 %v3681_v3, %v3235_v5 }
  0xf3   :  { %2087 = vmatpush.bf16.msra.mxu1 %v3218_v18  ;;  %v3677_v18 = vld [vmem:[#allocation8 + $0x94] sm:$0xf] }
  0xf4   :  { %2097 = vmatpush.bf16.msra.mxu2 %v3306_v23  ;;  %v3222_v33 = vor.u32 %v3677_v18, %v3219_v22  ;;  %v3385_v18 = vld [vmem:[#allocation8 + $0x1e0] sm:$0xf]  ;;  %v3693_v22 = vld [vmem:[#allocation8 + $0x114] sm:$0xf]  ;;  %v3283_v23 = vld [vmem:[#allocation8 + $0x118] sm:$0xf0] }
  0xf5   :  { %2074 = vmatpush.bf16.msra.mxu3 %v3154_v55  ;;  %v3166_v55 = vor.u32 %v3663_v35, %v3163_v8 }
  0xf6   :  { %v1432_v2 = vpop.f32.mrf.mxu0 }
  0xf7   :  { %2088 = vmatpush.bf16.msra.mxu1 %v3210_v29  ;;  %v1433_v6 = vadd.f32 %v1432_v2, %v1420_v61  ;;  %v1445_v10 = vpop.f32.mrf.mxu1  ;;  %v3158_v29 = vor.u32 %v3661_v13, %v3155_v15  ;;  %v3334_v61 = vor.u32 %v3705_v59, %v3331_v60  ;;  %v3315_v2 = vld [vmem:[#allocation8 + $0x158] sm:$0xf0]  ;;  %v3722_v13 = vld [vmem:[#allocation8 + $0x1f4] sm:$0xf0] }
  0xf8   :  { %v3318_v5 = vor.u32 %v3701_v1, %v3315_v2 }
  0xf9   :  { %2075 = vmatpush.bf16.msra.mxu3 %v3146_v24  ;;  %v1446_v12 = vadd.f32 %v1445_v10, %v1433_v6  ;;  %v3297_v24 = vld [vmem:[#allocation8 + $0x130] sm:$0xf]  ;;  %v3307_v6 = vld [vmem:[#allocation8 + $0x148] sm:$0xf0]  ;;  %v3697_v10 = vld [vmem:[#allocation8 + $0x134] sm:$0xf] }
  0xfa   :  { %v3298_v31 = vor.u32 %v3698_v25, %v3297_v24  ;;  %v3377_v24 = vld [vmem:[#allocation8 + $0x1d0] sm:$0xf]  ;;  %v3718_v25 = vld [vmem:[#allocation8 + $0x1d4] sm:$0xf0] }
  0xfb   :  { %2133 = vmatpush.bf16.msrb.mxu1 %v3270_v32  ;;  %v3147_v32 = vld [vmem:[#allocation8 + $0x8] sm:$0xf0] }
  0xfc   :  { %2076 = vmatmul.bf16.vlgmr.msra.gmra.mxu3 %v4033_v39  ;;  %2098 = vmatpush.bf16.msra.mxu2 %v3298_v31  ;;  %v3378_v31 = vor.u32 %v3718_v25, %v3377_v24  ;;  %v3709_v25 = vld [vmem:[#allocation8 + $0x194] sm:$0xf] }
  0xfd   :  { %2120 = vmatpush.bf16.msrb.mxu3 %v3206_v26 }
  0xfe   :  { %v1434_v21 = vpop.f32.mrf.mxu0 }
  0xff   :  { %2134 = vmatpush.bf16.msrb.mxu1 %v3262_v42  ;;  %v1458_v16 = vpop.f32.mrf.mxu3  ;;  %v1447_v38 = vpop.f32.mrf.mxu1  ;;  %v3150_v42 = vor.u32 %v3659_v45, %v3147_v32  ;;  %v3386_v21 = vor.u32 %v3720_v20, %v3385_v18  ;;  %v3286_v45 = vor.u32 %v3693_v22, %v3283_v23  ;;  %v3691_v32 = vld [vmem:[#allocation8 + $0x104] sm:$0xf]  ;;  %v3363_v18 = vld [vmem:[#allocation8 + $0x1b8] sm:$0xf0]  ;;  %v3355_v22 = vld [vmem:[#allocation8 + $0x1a8] sm:$0xf0] }
 0x100   :  { %v1459_v26 = vadd.f32 %v1458_v16, %v1446_v12  ;;  %2099 = vmatpush.bf16.msra.mxu2 %v3290_v43  ;;  %v3302_v12 = vor.u32 %v3697_v10, %v3299_v37  ;;  %v3695_v16 = vld [vmem:[#allocation8 + $0x124] sm:$0xf]  ;;  %v317_v23 = vperm.slane %v4019_v49, 3 }
 0x101   :  { %2121 = vmatpush.bf16.msrb.mxu3 %v3198_v40  ;;  %v3675_v40 = vld [vmem:[#allocation8 + $0x84] sm:$0xf] }
 0x102   :  { %v1471_v28 = vpop.f32.mrf.mxu2  ;;  %v3214_v44 = vor.u32 %v3675_v40, %v3211_v14  ;;  %v3369_v40 = vld [vmem:[#allocation8 + $0x1c0] sm:$0xf]  ;;  %v3716_v14 = vld [vmem:[#allocation8 + $0x1c4] sm:$0xf0] }
 0x103   :  { %2135 = vmatpush.bf16.msrb.mxu1 %v3254_v54  ;;  %v1472_v41 = vadd.f32 %v1471_v28, %v1459_v26  ;;  %v3692_v54 = vld [vmem:[#allocation8 + $0x104] sm:$0xf0]  ;;  %v316_v26 = vperm.slane %v4019_v49, 2 }
 0x104   :  { %v3274_v30 = vor.u32 %v3692_v54, %v3273_v27 }
 0x105   :  { %2122 = vmatpush.bf16.msrb.mxu3 %v3190_v52  ;;  %v3282_v52 = vor.u32 %v3694_v47, %v3281_v46 }
 0x106   :  { %v1484_v48 = vpop.f32.mrf.mxu0 }
 0x107   :  { %2136 = vmatpush.bf16.msrb.mxu1 %v3246_v0  ;;  %v1460_v51 = vpop.f32.mrf.mxu3  ;;  %v1485_v57 = vadd.f32 %v1484_v48, %v1472_v41  ;;  %2100 = vmatpush.bf16.msra.mxu2 %v3282_v52 }
 0x108   :  { %v3714_v51 = vld [vmem:[#allocation8 + $0x1b4] sm:$0xf0] }
 0x109   :  { %2123 = vmatpush.bf16.msrb.mxu3 %v3182_v62  ;;  %v1671_v53 = vmax.f32 %v1485_v57, 0.0  ;;  %v3703_v62 = vld [vmem:[#allocation8 + $0x164] sm:$0xf]  ;;  %v3353_v57 = vld [vmem:[#allocation8 + $0x1a0] sm:$0xf] }
 0x10a   :  { %v1473_v50 = vpop.f32.mrf.mxu2  ;;  %v3326_v63 = vor.u32 %v3703_v62, %v3323_v4  ;;  %v3337_v4 = vld [vmem:[#allocation8 + $0x180] sm:$0xf] }
 0x10b   :  { %2137 = vmatpush.bf16.msrb.mxu1 %v3238_v9  ;;  %v1675_v56 = vpack.c.bf16 %v1671_v53, %v1671_v53  ;;  %2101 = vmatpush.bf16.msra.mxu2 %v3274_v30  ;;  %v3712_v50 = vld [vmem:[#allocation8 + $0x1a4] sm:$0xf0]  ;;  %v3710_v30 = vld [vmem:[#allocation8 + $0x194] sm:$0xf0] }
 0x10c   :  { %v3354_v53 = vor.u32 %v3712_v50, %v3353_v57 }
 0x10d   :  { %2124 = vmatpush.bf16.msrb.mxu3 %v3174_v7  ;;  %2089 = vmatmul.bf16.vlgmr.msra.gmra.mxu1 %v1675_v56 }
 0x10e   :  { %v1486_v58 = vpop.f32.mrf.mxu0 }
 0x10f   :  { %2138 = vmatpush.bf16.msrb.mxu1 %v3230_v17  ;;  %2146 = vmatpush.bf16.msrb.mxu2 %v3334_v61  ;;  %v3291_v17 = vld [vmem:[#allocation8 + $0x128] sm:$0xf0] }
 0x110   :  { %v3294_v19 = vor.u32 %v3695_v16, %v3291_v17  ;;  %v3713_v17 = vld [vmem:[#allocation8 + $0x1b4] sm:$0xf] }
 0x111   :  { %2125 = vmatpush.bf16.msrb.mxu3 %v3166_v55  ;;  %v3393_v55 = vld [vmem:[#allocation8 + $0x1f0] sm:$0xf]  ;;  %v3366_v20 = vor.u32 %v3713_v17, %v3363_v18  ;;  %v3732_v17 = vld [vmem:[#allocation10 + $0x48] sm:$0xff] }
 0x112   :  { %v3394_v15 = vor.u32 %v3722_v13, %v3393_v55  ;;  %v3715_v13 = vld [vmem:[#allocation8 + $0x1c4] sm:$0xf] }
 0x113   :  { %2139 = vmatpush.bf16.msrb.mxu1 %v3222_v33  ;;  %2147 = vmatpush.bf16.msrb.mxu2 %v3326_v63  ;;  %v3275_v33 = vld [vmem:[#allocation8 + $0x108] sm:$0xf0]  ;;  %v3708_v63 = vld [vmem:[#allocation8 + $0x184] sm:$0xf0] }
 0x114   :  { %2107 = vmatpush.bf16.msra.mxu0 %v3394_v15  ;;  %v3278_v38 = vor.u32 %v3691_v32, %v3275_v33  ;;  %v3338_v1 = vor.u32 %v3708_v63, %v3337_v4  ;;  %v3371_v15 = vld [vmem:[#allocation8 + $0x1c8] sm:$0xf0] }
 0x115   :  { %2126 = vmatpush.bf16.msrb.mxu3 %v3158_v29  ;;  %v3374_v16 = vor.u32 %v3715_v13, %v3371_v15  ;;  %v3734_v13 = vld [vmem:[#allocation10 + $0x58] sm:$0xff] }
 0x117   :  { %2140 = vmatpush.bf16.msrb.mxu1 %v3214_v44  ;;  %v1497_v0 = vpop.f32.mrf.mxu1  ;;  %2148 = vmatpush.bf16.msrb.mxu2 %v3318_v5  ;;  %v3361_v44 = vld [vmem:[#allocation8 + $0x1b0] sm:$0xf]  ;;  %v3395_v5 = vld [vmem:[#allocation8 + $0x1f8] sm:$0xf0] }
 0x118   :  { %2108 = vmatpush.bf16.msra.mxu0 %v3386_v21  ;;  %v1498_v36 = vadd.f32 %v1497_v0, %v316_v26  ;;  %v3362_v48 = vor.u32 %v3714_v51, %v3361_v44  ;;  %v3711_v21 = vld [vmem:[#allocation8 + $0x1a4] sm:$0xf]  ;;  %v3347_v26 = vld [vmem:[#allocation8 + $0x198] sm:$0xf0] }
 0x119   :  { %2127 = vmatpush.bf16.msrb.mxu3 %v3150_v42  ;;  %v3370_v42 = vor.u32 %v3716_v14, %v3369_v40  ;;  %v3358_v24 = vor.u32 %v3711_v21, %v3355_v22 }
 0x11a   :  { %v1523_v3 = vpop.f32.mrf.mxu0 }
 0x11c   :  { %2128 = vmatmul.bf16.vlgmr.msrb.gmra.mxu3 %v4033_v39  ;;  %v3699_v39 = vld [vmem:[#allocation8 + $0x144] sm:$0xf]  ;;  %2109 = vmatpush.bf16.msra.mxu0 %v3378_v31 }
 0x11d   :  { %v3310_v35 = vor.u32 %v3699_v39, %v3307_v6  ;;  %2141 = vmatmul.bf16.vlgmr.msrb.gmra.mxu1 %v1675_v56  ;;  %v3345_v56 = vld [vmem:[#allocation8 + $0x190] sm:$0xf] }
 0x11e   :  { %v3346_v60 = vor.u32 %v3710_v30, %v3345_v56 }
 0x11f   :  { %v1499_v7 = vpop.f32.mrf.mxu1  ;;  %v1510_v9 = vpop.f32.mrf.mxu3  ;;  %2149 = vmatpush.bf16.msrb.mxu2 %v3310_v35  ;;  %v3387_v35 = vld [vmem:[#allocation8 + $0x1e8] sm:$0xf0] }
 0x120   :  { %v1511_v41 = vadd.f32 %v1510_v9, %v1498_v36  ;;  %2110 = vmatpush.bf16.msra.mxu0 %v3370_v42  ;;  %v3719_v7 = vld [vmem:[#allocation8 + $0x1e4] sm:$0xf]  ;;  %v3339_v36 = vld [vmem:[#allocation8 + $0x188] sm:$0xf0] }
 0x121   :  { %v3390_v9 = vor.u32 %v3719_v7, %v3387_v35  ;;  %v3737_v7 = vld [vmem:[#allocation10 + $0x70] sm:$0xff]  ;;  %v3726_v35 = vld [vmem:[#allocation10 + $0x18] sm:$0xff] }
 0x122   :  { %v1536_v8 = vpop.f32.mrf.mxu2  ;;  %v1525_v11 = vpop.f32.mrf.mxu0  ;;  %v1524_v46 = vadd.f32 %v1523_v3, %v1511_v41  ;;  %v3721_v3 = vld [vmem:[#allocation8 + $0x1f4] sm:$0xf] }
 0x123   :  { %2150 = vmatpush.bf16.msrb.mxu2 %v3302_v12  ;;  %v3398_v39 = vor.u32 %v3721_v3, %v3395_v5  ;;  %v3717_v11 = vld [vmem:[#allocation8 + $0x1d4] sm:$0xf]  ;;  %v3379_v12 = vld [vmem:[#allocation8 + $0x1d8] sm:$0xf0]  ;;  %v3728_v5 = vld [vmem:[#allocation10 + $0x28] sm:$0xff] }
 0x124   :  { %2111 = vmatpush.bf16.msra.mxu0 %v3362_v48  ;;  %v1537_v52 = vadd.f32 %v1536_v8, %v1524_v46  ;;  %v3382_v55 = vor.u32 %v3717_v11, %v3379_v12  ;;  %v3729_v3 = vld [vmem:[#allocation10 + $0x30] sm:$0xff]  ;;  %v3723_v12 = vld [vmem:[#allocation10] sm:$0xff] }
 0x127   :  { %v1512_v29 = vpop.f32.mrf.mxu3  ;;  %2151 = vmatpush.bf16.msrb.mxu2 %v3294_v19 }
 0x128   :  { %2112 = vmatpush.bf16.msra.mxu0 %v3354_v53 }
 0x12a   :  { %v1538_v28 = vpop.f32.mrf.mxu2  ;;  %v1575_v34 = vpop.f32.mrf.mxu0 }
 0x12b   :  { %2152 = vmatpush.bf16.msrb.mxu2 %v3286_v45  ;;  %v3350_v28 = vor.u32 %v3709_v25, %v3347_v26 }
 0x12c   :  { %2113 = vmatpush.bf16.msra.mxu0 %v3346_v60 }
 0x12f   :  { %2153 = vmatpush.bf16.msrb.mxu2 %v3278_v38 }
 0x130   :  { %2114 = vmatpush.bf16.msra.mxu0 %v3338_v1 }
 0x132   :  { %v1577_v43 = vpop.f32.mrf.mxu0 }
 0x134   :  { %2159 = vmatpush.bf16.msrb.mxu0 %v3398_v39  ;;  %v3727_v39 = vld [vmem:[#allocation10 + $0x20] sm:$0xff] }
 0x137   :  { %v1549_v47 = vpop.f32.mrf.mxu1 }
 0x138   :  { %v1550_v27 = vadd.f32 %v1549_v47, %v1537_v52  ;;  %2160 = vmatpush.bf16.msrb.mxu0 %v3390_v9  ;;  %v3725_v9 = vld [vmem:[#allocation10 + $0x10] sm:$0xff] }
 0x13c   :  { %2161 = vmatpush.bf16.msrb.mxu0 %v3382_v55  ;;  %v3735_v55 = vld [vmem:[#allocation10 + $0x60] sm:$0xff] }
 0x13e   :  { %v1601_v62 = vpop.f32.mrf.mxu0 }
 0x13f   :  { %v1562_v54 = vpop.f32.mrf.mxu3  ;;  %v1551_v59 = vpop.f32.mrf.mxu1 }
 0x140   :  { %v1563_v58 = vadd.f32 %v1562_v54, %v1550_v27  ;;  %2162 = vmatpush.bf16.msrb.mxu0 %v3374_v16  ;;  %v1742_v27 = vld [vmem:[%s4052_s4] sm:$0x3]  ;;  %v3733_v16 = vld [vmem:[#allocation10 + $0x50] sm:$0xff] }
 0x141   :  { %v1744_v54 = vperm.slane %v1742_v27, 0 }
 0x142   :  { %v1588_v61 = vpop.f32.mrf.mxu2  ;;  %v1576_v0 = vadd.f32 %v1575_v34, %v1563_v58  ;;  %v3707_v34 = vld [vmem:[#allocation8 + $0x184] sm:$0xf] }
 0x143   :  { %v1589_v45 = vadd.f32 %v1588_v61, %v317_v23  ;;  %v3342_v40 = vor.u32 %v3707_v34, %v3339_v36  ;;  %v1745_v61 = vperm.slane %v1742_v27, 1  ;;  %v3751_v34 = vld [vmem:[%s4054_s6] ss:$0 sm:$0xff] }
 0x144   :  { %v1672_v2 = vmax.f32 %v1576_v0, 0.0  ;;  %2163 = vmatpush.bf16.msrb.mxu0 %v3366_v20 }
 0x145   :  { %v1602_v38 = vadd.f32 %v1601_v62, %v1589_v45 }
 0x146   :  { %v1676_v6 = vpack.c.bf16 %v1672_v2, %v1672_v2  ;;  %v1603_v37 = vpop.f32.mrf.mxu0  ;;  %v3730_v2 = vld [vmem:[#allocation10 + $0x38] sm:$0xff] }
 0x147   :  { %v1564_v8 = vpop.f32.mrf.mxu3  ;;  %2308 = vmatpush.bf16.msra.mxu3 %v3730_v2  ;;  %v3736_v37 = vld [vmem:[#allocation10 + $0x68] sm:$0xff] }
 0x148   :  { %2102 = vmatmul.bf16.vlgmr.msra.gmra.mxu2 %v1676_v6  ;;  %2164 = vmatpush.bf16.msrb.mxu0 %v3358_v24 }
 0x14a   :  { %v1590_v10 = vpop.f32.mrf.mxu2 }
 0x14b   :  { %2309 = vmatpush.bf16.msra.mxu3 %v3729_v3  ;;  %v3724_v10 = vld [vmem:[#allocation10 + $0x8] sm:$0xff] }
 0x14c   :  { %2165 = vmatpush.bf16.msrb.mxu0 %v3350_v28 }
 0x14f   :  { %2310 = vmatpush.bf16.msra.mxu3 %v3728_v5 }
 0x150   :  { %2166 = vmatpush.bf16.msrb.mxu0 %v3342_v40 }
 0x153   :  { %2311 = vmatpush.bf16.msra.mxu3 %v3727_v39 }
 0x157   :  { %v1614_v19 = vpop.f32.mrf.mxu1  ;;  %2312 = vmatpush.bf16.msra.mxu3 %v3726_v35 }
 0x158   :  { %2154 = vmatmul.bf16.vlgmr.msrb.gmra.mxu2 %v1676_v6  ;;  %v1615_v14 = vadd.f32 %v1614_v19, %v1602_v38  ;;  %v3738_v6 = vld [vmem:[#allocation10 + $0x78] sm:$0xff]  ;;  %v3731_v19 = vld [vmem:[#allocation10 + $0x40] sm:$0xff] }
 0x159   :  { %2321 = vmatpush.bf16.msra.mxu1 %v3738_v6 }
 0x15b   :  { %2313 = vmatpush.bf16.msra.mxu3 %v3725_v9 }
 0x15d   :  { %2322 = vmatpush.bf16.msra.mxu1 %v3737_v7 }
 0x15e   :  { %v1653_v33 = vpop.f32.mrf.mxu0 }
 0x15f   :  { %v1627_v29 = vpop.f32.mrf.mxu3  ;;  %v1616_v31 = vpop.f32.mrf.mxu1  ;;  %2314 = vmatpush.bf16.msra.mxu3 %v3724_v10 }
 0x160   :  { %v1628_v42 = vadd.f32 %v1627_v29, %v1615_v14 }
 0x161   :  { %2323 = vmatpush.bf16.msra.mxu1 %v3736_v37 }
 0x162   :  { %v1640_v32 = vpop.f32.mrf.mxu2 }
 0x163   :  { %v1641_v44 = vadd.f32 %v1640_v32, %v1628_v42  ;;  %2315 = vmatpush.bf16.msra.mxu3 %v3723_v12 }
 0x165   :  { %v1654_v51 = vadd.f32 %v1653_v33, %v1641_v44  ;;  %2324 = vmatpush.bf16.msra.mxu1 %v3735_v55 }
 0x166   :  { %v1655_v43 = vpop.f32.mrf.mxu0 }
 0x167   :  { %v1629_v41 = vpop.f32.mrf.mxu3 }
 0x169   :  { %2325 = vmatpush.bf16.msra.mxu1 %v3734_v13 }
 0x16a   :  { %v1642_v49 = vpop.f32.mrf.mxu2 }
 0x16d   :  { %2326 = vmatpush.bf16.msra.mxu1 %v3733_v16 }
 0x171   :  { %2327 = vmatpush.bf16.msra.mxu1 %v3732_v17 }
 0x172   :  { %v1666_v46 = vpop.f32.mrf.mxu2 }
 0x173   :  { %v1667_v47 = vadd.f32 %v1666_v46, %v1654_v51 }
 0x175   :  { %v1673_v48 = vmax.f32 %v1667_v47, 0.0  ;;  %2328 = vmatpush.bf16.msra.mxu1 %v3731_v19 }
 0x177   :  { %v1677_v57 = vpack.c.bf16 %v1673_v48, %v1673_v48 }
 0x179   :  { %2115 = vmatmul.bf16.vlgmr.msra.gmra.mxu0 %v1677_v57 }
 0x17a   :  { %v1668_v50 = vpop.f32.mrf.mxu2 }
 0x17f   :  { %v2077_v52 = vpop.f32.mrf.mxu3 }
 0x180   :  { %v2078_v56 = vadd.f32 %v2077_v52, %v1744_v54 }
 0x187   :  { %v2079_v53 = vpop.f32.mrf.mxu3 }
 0x189   :  { %2167 = vmatmul.bf16.vlgmr.msrb.gmra.mxu0 %v1677_v57 }
 0x18a   :  { %v2090_v30 = vpop.f32.mrf.mxu1 }
 0x18b   :  { %v2091_v58 = vadd.f32 %v2090_v30, %v2078_v56 }
 0x192   :  { %v2092_v60 = vpop.f32.mrf.mxu1 }
 0x19a   :  { %v2142_v63 = vpop.f32.mrf.mxu1 }
 0x19f   :  { %v2129_v59 = vpop.f32.mrf.mxu3 }
 0x1a0   :  { %v2130_v4 = vadd.f32 %v2129_v59, %v1745_v61 }
 0x1a2   :  { %v2143_v0 = vadd.f32 %v2142_v63, %v2130_v4  ;;  %v2144_v1 = vpop.f32.mrf.mxu1 }
 0x1a7   :  { %v2131_v62 = vpop.f32.mrf.mxu3 }
 0x1cb   :  { %v2103_v8 = vpop.f32.mrf.mxu2 }
 0x1cc   :  { %v2104_v20 = vadd.f32 %v2103_v8, %v2091_v58 }
 0x1d3   :  { %v2105_v11 = vpop.f32.mrf.mxu2 }
 0x1db   :  { %v2155_v15 = vpop.f32.mrf.mxu2 }
 0x1dc   :  { %v2156_v26 = vadd.f32 %v2155_v15, %v2143_v0 }
 0x1e3   :  { %v2157_v18 = vpop.f32.mrf.mxu2 }
 0x1f6   :  { %v2116_v21 = vpop.f32.mrf.mxu0 }
 0x1f7   :  { %v2117_v22 = vadd.f32 %v2116_v21, %v2104_v20 }
 0x1f9   :  { %v2172_v23 = vmax.f32 %v2117_v22, 0.0 }
 0x1fb   :  { %v2174_v24 = vpack.c.bf16 %v2172_v23, %v2172_v23 }
 0x1fd   :  { %2316 = vmatmul.bf16.vlgmr.msra.gmra.mxu3 %v2174_v24 }
 0x1fe   :  { %v2118_v25 = vpop.f32.mrf.mxu0 }
 0x206   :  { %v2168_v28 = vpop.f32.mrf.mxu0 }
 0x207   :  { %v2169_v29 = vadd.f32 %v2168_v28, %v2156_v26 }
 0x209   :  { %v2173_v45 = vmax.f32 %v2169_v29, 0.0 }
 0x20b   :  { %v2175_v31 = vpack.c.bf16 %v2173_v45, %v2173_v45 }
 0x20d   :  { %2329 = vmatmul.bf16.vlgmr.msra.gmra.mxu1 %v2175_v31 }
 0x20e   :  { %v2170_v32 = vpop.f32.mrf.mxu0 }
 0x280   :  { %v2317_v33 = vpop.f32.mrf.mxu3 }
 0x281   :  { %v2318_v38 = vadd.f32 %v3751_v34, %v2317_v33 }
 0x288   :  { %v2319_v36 = vpop.f32.mrf.mxu3 }
 0x28a   :  { %v2330_v40 = vpop.f32.mrf.mxu1 }
 0x28b   :  { %v2331_v14 = vadd.f32 %v2330_v40, %v2318_v38 }
 0x28d   :  { %v2334_v41 = vpack.c.bf16 %v2331_v14, %v2331_v14 }
 0x28f   :  { %2335 = vst [vmem:[#allocation11] sm:$0xf] %v2334_v41 }
 0x290   :  { %2346 = dma.vmem_to_hbm [thread:$0]  %s2342_s8, 64, %s2344_s11, [#allocation4]  }
 0x292   :  { %v2332_v42 = vpop.f32.mrf.mxu1 }
 0x293   :  { %3902 = dma.done.wait [#allocation4], 64  }
 0x294   :  { %3903 = vsyncadd [#allocation4], 4294967232 }
 0x295   :  { %2351 = vsyncpa [#allocation3], 1 }
 0x296   :  { %2352 = vsyncpa [#allocation6], 1 }
 0x297   :  { %2353 = vsyncpa [#allocation9], 1 }
 0x298   :  { %2354 = vsyncpa [#allocation4], 1 }

</bundles_post_ra>
